<compile_context>
chip_gen: v5e
topology: v5e:2x2
jax: 0.10.0
libtpu: 0.0.40
codegen_flags: <defaults>
</compile_context>

<pallas_src>
import functools

import jax
import jax.numpy as jnp
from jax import lax
from jax.experimental import pallas as pl
from jax.experimental.pallas import tpu as pltpu

C_IN = 31
C_OUT = 3
K = 3  # kernel size


def _conv3x3_kernel(x_ref, w_ref, o_ref, xp_ref, *, H, W, B_TILE, PAD):
    # x_ref : (B_TILE, C_IN, H*W)      B_TILE images, spatial flattened on lanes
    # w_ref : (K*K, C_OUT, C_IN)       per-tap weight matrices
    # o_ref : (B_TILE, C_OUT, H*W)
    # xp_ref: (C_IN, H*W + 2*PAD)      VMEM scratch: zero-padded flat image
    HW = H * W

    # Zero ONLY the two pad strips (the interior is rewritten per image below).
    # PAD >= W+1 guarantees every row-out-of-bounds tap lands inside a strip.
    xp_ref[:, pl.ds(0, PAD)] = jnp.zeros((C_IN, PAD), dtype=xp_ref.dtype)
    xp_ref[:, pl.ds(PAD + HW, PAD)] = jnp.zeros((C_IN, PAD), dtype=xp_ref.dtype)

    # Column masks for the dx = -1 / +1 taps, hoisted out of the unrolled loop.
    col = lax.broadcasted_iota(jnp.int32, (1, HW), 1) % W
    mask_l = col >= 1          # kx == 0: leftmost column has no left neighbour
    mask_r = col <= W - 2      # kx == 2: rightmost column has no right neighbour

    for b in range(B_TILE):
        # Lane-aligned interior write (PAD is a multiple of 128).
        xp_ref[:, pl.ds(PAD, HW)] = x_ref[b]

        acc = jnp.zeros((C_OUT, HW), dtype=jnp.float32)
        for ky in range(K):
            for kx in range(K):
                # Tap (ky, kx) == shift by (ky-1, kx-1); in the padded flat
                # buffer that is a static lane slice.
                start = PAD + (ky - 1) * W + (kx - 1)
                tap = xp_ref[:, pl.ds(start, HW)]            # (C_IN, HW)
                if kx == 0:
                    tap = jnp.where(mask_l, tap, 0.0)
                elif kx == 2:
                    tap = jnp.where(mask_r, tap, 0.0)
                w_tap = w_ref[ky * K + kx]                   # (C_OUT, C_IN)
                acc = acc + lax.dot_general(
                    w_tap, tap,
                    dimension_numbers=(((1,), (0,)), ((), ())),
                    preferred_element_type=jnp.float32,
                )
        o_ref[b] = acc.astype(o_ref.dtype)


def _pick_batch_tile(n):
    # Amortize fixed per-grid-step overhead by packing several images per step,
    # but keep >= 2 parallel steps so v7x's two TensorCores both get work.
    # (v5e/v6e have one TC and only pay step overhead for extra steps.)
    for b in (8, 4, 2):
        if n % b == 0 and n // b >= 2:
            return b
    return 1


@jax.jit
def revert_net_forward(x_nchw, weight_oihw):
    """Forward pass of RevertNet.

    x_nchw:      (N, 31, H, W)  -- PyTorch NCHW convention
    weight_oihw: (3, 31, 3, 3)  -- PyTorch OIHW convention
    returns:     (N, 3, H, W)   -- matches nn.Conv2d(31, 3, 3, 1, 1, bias=False)
    """
    N, C, H, W = x_nchw.shape
    assert C == C_IN
    HW = H * W
    # Lane-aligned flat pad; must cover one image row + one pixel on each side.
    PAD = ((W + 1 + 127) // 128) * 128
    B_TILE = _pick_batch_tile(N)

    # Free layout glue: collapsing trailing contiguous dims is a bitcast; the
    # weight reshuffle touches only 3*31*3*3 elements.
    x_flat = x_nchw.reshape(N, C_IN, HW)                                   # (N, C_IN, HW)
    w_taps = jnp.transpose(weight_oihw, (2, 3, 0, 1)).reshape(K * K, C_OUT, C_IN)

    kernel = functools.partial(_conv3x3_kernel, H=H, W=W, B_TILE=B_TILE, PAD=PAD)

    dtype_bytes = jnp.dtype(x_nchw.dtype).itemsize
    cost = pl.CostEstimate(
        flops=2 * N * HW * C_OUT * C_IN * K * K,
        transcendentals=0,
        bytes_accessed=N * (C_IN + C_OUT) * HW * dtype_bytes
        + K * K * C_OUT * C_IN * dtype_bytes,
    )

    out_flat = pl.pallas_call(
        kernel,
        out_shape=jax.ShapeDtypeStruct((N, C_OUT, HW), x_nchw.dtype),
        grid_spec=pltpu.PrefetchScalarGridSpec(
            num_scalar_prefetch=0,
            grid=(N // B_TILE,),
            in_specs=[
                pl.BlockSpec((B_TILE, C_IN, HW), lambda n: (n, 0, 0)),
                pl.BlockSpec((K * K, C_OUT, C_IN), lambda n: (0, 0, 0)),
            ],
            out_specs=pl.BlockSpec((B_TILE, C_OUT, HW), lambda n: (n, 0, 0)),
            scratch_shapes=[
                pltpu.VMEM((C_IN, HW + 2 * PAD), x_nchw.dtype),
            ],
        ),
        compiler_params=pltpu.CompilerParams(
            dimension_semantics=("parallel",),
        ),
        cost_estimate=cost,
    )(x_flat, w_taps)

    return out_flat.reshape(N, C_OUT, H, W)


def _xavier_normal_oihw(key, c_out, c_in, kh, kw, dtype=jnp.float32):
    # Deterministic xavier_normal-like init (same shape as nn.Conv2d weight).
    fan_in = c_in * kh * kw
    fan_out = c_out * kh * kw
    std = (2.0 / (fan_in + fan_out)) ** 0.5
    return std * jax.random.normal(key, (c_out, c_in, kh, kw), dtype=dtype)


if __name__ == "__main__":
    key = jax.random.PRNGKey(0)
    k_x, k_w = jax.random.split(key)

    # Small shapes consistent with the module: C_in=31 is fixed by the conv;
    # batch=4 exercises the per-step batching (B_TILE=2 -> 2 parallel steps).
    x = jax.random.normal(k_x, (4, C_IN, 16, 16), dtype=jnp.float32)
    w = _xavier_normal_oihw(k_w, C_OUT, C_IN, K, K)

    out = jax.block_until_ready(revert_net_forward(x, w))

    # Reference check against XLA's conv (same semantics as nn.Conv2d, bias=False).
    ref = lax.conv_general_dilated(
        x, w, window_strides=(1, 1), padding=((1, 1), (1, 1)),
        dimension_numbers=("NCHW", "OIHW", "NCHW"),
    )
    assert out.shape == (4, C_OUT, 16, 16)
    assert jnp.allclose(out, ref, atol=1e-4, rtol=1e-4)

    print("KERNEL_OK")
</pallas_src>

<mosaic_0001>
module attributes {stable_mosaic.version = 11 : i64} {
  func.func @_conv3x3_kernel(%arg0: i32, %arg1: memref<2x31x256xf32, #tpu.memory_space<vmem>>, %arg2: memref<9x3x31xf32, #tpu.memory_space<vmem>>, %arg3: memref<2x3x256xf32, #tpu.memory_space<vmem>>, %arg4: memref<31x512xf32, #tpu.memory_space<vmem>>) attributes {dimension_semantics = [#tpu.dimension_semantics<parallel>], iteration_bounds = array<i64: 2>, scalar_prefetch = 0 : i64, scratch_operands = 1 : i64, tpu.core_type = #tpu.core_type<tc>, window_params = [{transform_indices = @transform_0, window_bounds = array<i64: 2, 31, 256>}, {pipeline_mode = #tpu.pipeline_mode<synchronous>, transform_indices = @transform_1, window_bounds = array<i64: 9, 3, 31>}, {transform_indices = @transform_2, window_bounds = array<i64: 2, 3, 256>}]} {
    %cst = arith.constant 0.000000e+00 : f32
    %0 = vector.broadcast %cst : f32 to vector<31x128xf32>
    %c0 = arith.constant 0 : index
    %c0_0 = arith.constant 0 : index
    %1 = vector.load %arg4[%c0, %c0_0] : memref<31x512xf32, #tpu.memory_space<vmem>>, vector<31x128xf32>
    tpu.vector_store %arg4[%c0, %c0_0], %0 {strides = array<i32>} : memref<31x512xf32, #tpu.memory_space<vmem>>, vector<31x128xf32>,
    %cst_1 = arith.constant 0.000000e+00 : f32
    %2 = vector.broadcast %cst_1 : f32 to vector<31x128xf32>
    %c0_2 = arith.constant 0 : index
    %c384 = arith.constant 384 : index
    %3 = vector.load %arg4[%c0_2, %c384] : memref<31x512xf32, #tpu.memory_space<vmem>>, vector<31x128xf32>
    tpu.vector_store %arg4[%c0_2, %c384], %2 {strides = array<i32>} : memref<31x512xf32, #tpu.memory_space<vmem>>, vector<31x128xf32>,
    %4 = tpu.iota {dimensions = array<i32: 1>} : vector<1x256xi32>
    %c16_i32 = arith.constant 16 : i32
    %c0_i32 = arith.constant 0 : i32
    %5 = arith.cmpi eq, %c16_i32, %c0_i32 : i32
    %c1_i32 = arith.constant 1 : i32
    %6 = arith.select %5, %c1_i32, %c16_i32 : i32
    %7 = vector.broadcast %6 : i32 to vector<1x256xi32>
    %8 = arith.remsi %4, %7 : vector<1x256xi32>
    %c0_i32_3 = arith.constant 0 : i32
    %9 = vector.broadcast %c0_i32_3 : i32 to vector<1x256xi32>
    %10 = arith.cmpi ne, %8, %9 : vector<1x256xi32>
    %c0_i32_4 = arith.constant 0 : i32
    %11 = vector.broadcast %c0_i32_4 : i32 to vector<1x256xi32>
    %12 = arith.cmpi slt, %8, %11 : vector<1x256xi32>
    %c0_i32_5 = arith.constant 0 : i32
    %13 = arith.cmpi slt, %6, %c0_i32_5 : i32
    %14 = vector.broadcast %13 : i1 to vector<1x256xi1>
    %15 = vector.broadcast %14 : vector<1x256xi1> to vector<1x256xi1>
    %16 = arith.xori %12, %15 : vector<1x256xi1>
    %17 = arith.andi %16, %10 : vector<1x256xi1>
    %18 = vector.broadcast %6 : i32 to vector<1x256xi32>
    %19 = arith.addi %8, %18 : vector<1x256xi32>
    %20 = arith.select %17, %19, %8 : vector<1x256xi1>, vector<1x256xi32>
    %c1_i32_6 = arith.constant 1 : i32
    %21 = vector.broadcast %c1_i32_6 : i32 to vector<1x256xi32>
    %22 = arith.cmpi sge, %20, %21 : vector<1x256xi32>
    %c14_i32 = arith.constant 14 : i32
    %23 = vector.broadcast %c14_i32 : i32 to vector<1x256xi32>
    %24 = arith.cmpi sle, %20, %23 : vector<1x256xi32>
    %c0_7 = arith.constant 0 : index
    %c0_8 = arith.constant 0 : index
    %c0_9 = arith.constant 0 : index
    %25 = vector.load %arg1[%c0_7, %c0_8, %c0_9] : memref<2x31x256xf32, #tpu.memory_space<vmem>>, vector<1x31x256xf32>
    %26 = vector.shape_cast %25 : vector<1x31x256xf32> to vector<31x256xf32>
    %c0_10 = arith.constant 0 : index
    %c128 = arith.constant 128 : index
    %27 = vector.load %arg4[%c0_10, %c128] : memref<31x512xf32, #tpu.memory_space<vmem>>, vector<31x256xf32>
    tpu.vector_store %arg4[%c0_10, %c128], %26 {strides = array<i32>} : memref<31x512xf32, #tpu.memory_space<vmem>>, vector<31x256xf32>,
    %cst_11 = arith.constant 0.000000e+00 : f32
    %28 = vector.broadcast %cst_11 : f32 to vector<3x256xf32>
    %c0_12 = arith.constant 0 : index
    %c111 = arith.constant 111 : index
    %29 = vector.load %arg4[%c0_12, %c111] : memref<31x512xf32, #tpu.memory_space<vmem>>, vector<31x256xf32>
    %cst_13 = arith.constant 0.000000e+00 : f32
    %30 = vector.shape_cast %22 : vector<1x256xi1> to vector<1x256xi1>
    %31 = vector.broadcast %30 : vector<1x256xi1> to vector<31x256xi1>
    %32 = vector.broadcast %cst_13 : f32 to vector<31x256xf32>
    %33 = arith.select %31, %29, %32 : vector<31x256xi1>, vector<31x256xf32>
    %c0_14 = arith.constant 0 : index
    %c0_15 = arith.constant 0 : index
    %c0_16 = arith.constant 0 : index
    %34 = vector.load %arg2[%c0_14, %c0_15, %c0_16] : memref<9x3x31xf32, #tpu.memory_space<vmem>>, vector<1x3x31xf32>
    %35 = vector.shape_cast %34 : vector<1x3x31xf32> to vector<3x31xf32>
    %cst_17 = arith.constant dense<0.000000e+00> : vector<3x256xf32>
    %36 = tpu.matmul %35, %33, %cst_17 {dimension_numbers = #tpu.dot_dimension_numbers<[1], [0], [0], [1], [0, 0, 1, 1], [], []>} : vector<3x31xf32>, vector<31x256xf32>, vector<3x256xf32> -> vector<3x256xf32>
    %37 = arith.addf %28, %36 : vector<3x256xf32>
    %c0_18 = arith.constant 0 : index
    %c112 = arith.constant 112 : index
    %38 = vector.load %arg4[%c0_18, %c112] : memref<31x512xf32, #tpu.memory_space<vmem>>, vector<31x256xf32>
    %c1 = arith.constant 1 : index
    %c0_19 = arith.constant 0 : index
    %c0_20 = arith.constant 0 : index
    %39 = vector.load %arg2[%c1, %c0_19, %c0_20] : memref<9x3x31xf32, #tpu.memory_space<vmem>>, vector<1x3x31xf32>
    %40 = vector.shape_cast %39 : vector<1x3x31xf32> to vector<3x31xf32>
    %cst_21 = arith.constant dense<0.000000e+00> : vector<3x256xf32>
    %41 = tpu.matmul %40, %38, %cst_21 {dimension_numbers = #tpu.dot_dimension_numbers<[1], [0], [0], [1], [0, 0, 1, 1], [], []>} : vector<3x31xf32>, vector<31x256xf32>, vector<3x256xf32> -> vector<3x256xf32>
    %42 = arith.addf %37, %41 : vector<3x256xf32>
    %c0_22 = arith.constant 0 : index
    %c113 = arith.constant 113 : index
    %43 = vector.load %arg4[%c0_22, %c113] : memref<31x512xf32, #tpu.memory_space<vmem>>, vector<31x256xf32>
    %cst_23 = arith.constant 0.000000e+00 : f32
    %44 = vector.shape_cast %24 : vector<1x256xi1> to vector<1x256xi1>
    %45 = vector.broadcast %44 : vector<1x256xi1> to vector<31x256xi1>
    %46 = vector.broadcast %cst_23 : f32 to vector<31x256xf32>
    %47 = arith.select %45, %43, %46 : vector<31x256xi1>, vector<31x256xf32>
    %c2 = arith.constant 2 : index
    %c0_24 = arith.constant 0 : index
    %c0_25 = arith.constant 0 : index
    %48 = vector.load %arg2[%c2, %c0_24, %c0_25] : memref<9x3x31xf32, #tpu.memory_space<vmem>>, vector<1x3x31xf32>
    %49 = vector.shape_cast %48 : vector<1x3x31xf32> to vector<3x31xf32>
    %cst_26 = arith.constant dense<0.000000e+00> : vector<3x256xf32>
    %50 = tpu.matmul %49, %47, %cst_26 {dimension_numbers = #tpu.dot_dimension_numbers<[1], [0], [0], [1], [0, 0, 1, 1], [], []>} : vector<3x31xf32>, vector<31x256xf32>, vector<3x256xf32> -> vector<3x256xf32>
    %51 = arith.addf %42, %50 : vector<3x256xf32>
    %c0_27 = arith.constant 0 : index
    %c127 = arith.constant 127 : index
    %52 = vector.load %arg4[%c0_27, %c127] : memref<31x512xf32, #tpu.memory_space<vmem>>, vector<31x256xf32>
    %cst_28 = arith.constant 0.000000e+00 : f32
    %53 = vector.shape_cast %22 : vector<1x256xi1> to vector<1x256xi1>
    %54 = vector.broadcast %53 : vector<1x256xi1> to vector<31x256xi1>
    %55 = vector.broadcast %cst_28 : f32 to vector<31x256xf32>
    %56 = arith.select %54, %52, %55 : vector<31x256xi1>, vector<31x256xf32>
    %c3 = arith.constant 3 : index
    %c0_29 = arith.constant 0 : index
    %c0_30 = arith.constant 0 : index
    %57 = vector.load %arg2[%c3, %c0_29, %c0_30] : memref<9x3x31xf32, #tpu.memory_space<vmem>>, vector<1x3x31xf32>
    %58 = vector.shape_cast %57 : vector<1x3x31xf32> to vector<3x31xf32>
    %cst_31 = arith.constant dense<0.000000e+00> : vector<3x256xf32>
    %59 = tpu.matmul %58, %56, %cst_31 {dimension_numbers = #tpu.dot_dimension_numbers<[1], [0], [0], [1], [0, 0, 1, 1], [], []>} : vector<3x31xf32>, vector<31x256xf32>, vector<3x256xf32> -> vector<3x256xf32>
    %60 = arith.addf %51, %59 : vector<3x256xf32>
    %c0_32 = arith.constant 0 : index
    %c128_33 = arith.constant 128 : index
    %61 = vector.load %arg4[%c0_32, %c128_33] : memref<31x512xf32, #tpu.memory_space<vmem>>, vector<31x256xf32>
    %c4 = arith.constant 4 : index
    %c0_34 = arith.constant 0 : index
    %c0_35 = arith.constant 0 : index
    %62 = vector.load %arg2[%c4, %c0_34, %c0_35] : memref<9x3x31xf32, #tpu.memory_space<vmem>>, vector<1x3x31xf32>
    %63 = vector.shape_cast %62 : vector<1x3x31xf32> to vector<3x31xf32>
    %cst_36 = arith.constant dense<0.000000e+00> : vector<3x256xf32>
    %64 = tpu.matmul %63, %61, %cst_36 {dimension_numbers = #tpu.dot_dimension_numbers<[1], [0], [0], [1], [0, 0, 1, 1], [], []>} : vector<3x31xf32>, vector<31x256xf32>, vector<3x256xf32> -> vector<3x256xf32>
    %65 = arith.addf %60, %64 : vector<3x256xf32>
    %c0_37 = arith.constant 0 : index
    %c129 = arith.constant 129 : index
    %66 = vector.load %arg4[%c0_37, %c129] : memref<31x512xf32, #tpu.memory_space<vmem>>, vector<31x256xf32>
    %cst_38 = arith.constant 0.000000e+00 : f32
    %67 = vector.shape_cast %24 : vector<1x256xi1> to vector<1x256xi1>
    %68 = vector.broadcast %67 : vector<1x256xi1> to vector<31x256xi1>
    %69 = vector.broadcast %cst_38 : f32 to vector<31x256xf32>
    %70 = arith.select %68, %66, %69 : vector<31x256xi1>, vector<31x256xf32>
    %c5 = arith.constant 5 : index
    %c0_39 = arith.constant 0 : index
    %c0_40 = arith.constant 0 : index
    %71 = vector.load %arg2[%c5, %c0_39, %c0_40] : memref<9x3x31xf32, #tpu.memory_space<vmem>>, vector<1x3x31xf32>
    %72 = vector.shape_cast %71 : vector<1x3x31xf32> to vector<3x31xf32>
    %cst_41 = arith.constant dense<0.000000e+00> : vector<3x256xf32>
    %73 = tpu.matmul %72, %70, %cst_41 {dimension_numbers = #tpu.dot_dimension_numbers<[1], [0], [0], [1], [0, 0, 1, 1], [], []>} : vector<3x31xf32>, vector<31x256xf32>, vector<3x256xf32> -> vector<3x256xf32>
    %74 = arith.addf %65, %73 : vector<3x256xf32>
    %c0_42 = arith.constant 0 : index
    %c143 = arith.constant 143 : index
    %75 = vector.load %arg4[%c0_42, %c143] : memref<31x512xf32, #tpu.memory_space<vmem>>, vector<31x256xf32>
    %cst_43 = arith.constant 0.000000e+00 : f32
    %76 = vector.shape_cast %22 : vector<1x256xi1> to vector<1x256xi1>
    %77 = vector.broadcast %76 : vector<1x256xi1> to vector<31x256xi1>
    %78 = vector.broadcast %cst_43 : f32 to vector<31x256xf32>
    %79 = arith.select %77, %75, %78 : vector<31x256xi1>, vector<31x256xf32>
    %c6 = arith.constant 6 : index
    %c0_44 = arith.constant 0 : index
    %c0_45 = arith.constant 0 : index
    %80 = vector.load %arg2[%c6, %c0_44, %c0_45] : memref<9x3x31xf32, #tpu.memory_space<vmem>>, vector<1x3x31xf32>
    %81 = vector.shape_cast %80 : vector<1x3x31xf32> to vector<3x31xf32>
    %cst_46 = arith.constant dense<0.000000e+00> : vector<3x256xf32>
    %82 = tpu.matmul %81, %79, %cst_46 {dimension_numbers = #tpu.dot_dimension_numbers<[1], [0], [0], [1], [0, 0, 1, 1], [], []>} : vector<3x31xf32>, vector<31x256xf32>, vector<3x256xf32> -> vector<3x256xf32>
    %83 = arith.addf %74, %82 : vector<3x256xf32>
    %c0_47 = arith.constant 0 : index
    %c144 = arith.constant 144 : index
    %84 = vector.load %arg4[%c0_47, %c144] : memref<31x512xf32, #tpu.memory_space<vmem>>, vector<31x256xf32>
    %c7 = arith.constant 7 : index
    %c0_48 = arith.constant 0 : index
    %c0_49 = arith.constant 0 : index
    %85 = vector.load %arg2[%c7, %c0_48, %c0_49] : memref<9x3x31xf32, #tpu.memory_space<vmem>>, vector<1x3x31xf32>
    %86 = vector.shape_cast %85 : vector<1x3x31xf32> to vector<3x31xf32>
    %cst_50 = arith.constant dense<0.000000e+00> : vector<3x256xf32>
    %87 = tpu.matmul %86, %84, %cst_50 {dimension_numbers = #tpu.dot_dimension_numbers<[1], [0], [0], [1], [0, 0, 1, 1], [], []>} : vector<3x31xf32>, vector<31x256xf32>, vector<3x256xf32> -> vector<3x256xf32>
    %88 = arith.addf %83, %87 : vector<3x256xf32>
    %c0_51 = arith.constant 0 : index
    %c145 = arith.constant 145 : index
    %89 = vector.load %arg4[%c0_51, %c145] : memref<31x512xf32, #tpu.memory_space<vmem>>, vector<31x256xf32>
    %cst_52 = arith.constant 0.000000e+00 : f32
    %90 = vector.shape_cast %24 : vector<1x256xi1> to vector<1x256xi1>
    %91 = vector.broadcast %90 : vector<1x256xi1> to vector<31x256xi1>
    %92 = vector.broadcast %cst_52 : f32 to vector<31x256xf32>
    %93 = arith.select %91, %89, %92 : vector<31x256xi1>, vector<31x256xf32>
    %c8 = arith.constant 8 : index
    %c0_53 = arith.constant 0 : index
    %c0_54 = arith.constant 0 : index
    %94 = vector.load %arg2[%c8, %c0_53, %c0_54] : memref<9x3x31xf32, #tpu.memory_space<vmem>>, vector<1x3x31xf32>
    %95 = vector.shape_cast %94 : vector<1x3x31xf32> to vector<3x31xf32>
    %cst_55 = arith.constant dense<0.000000e+00> : vector<3x256xf32>
    %96 = tpu.matmul %95, %93, %cst_55 {dimension_numbers = #tpu.dot_dimension_numbers<[1], [0], [0], [1], [0, 0, 1, 1], [], []>} : vector<3x31xf32>, vector<31x256xf32>, vector<3x256xf32> -> vector<3x256xf32>
    %97 = arith.addf %88, %96 : vector<3x256xf32>
    %c0_56 = arith.constant 0 : index
    %c0_57 = arith.constant 0 : index
    %c0_58 = arith.constant 0 : index
    %98 = vector.load %arg3[%c0_56, %c0_57, %c0_58] : memref<2x3x256xf32, #tpu.memory_space<vmem>>, vector<1x3x256xf32>
    %99 = vector.shape_cast %98 : vector<1x3x256xf32> to vector<3x256xf32>
    %100 = vector.shape_cast %97 : vector<3x256xf32> to vector<1x3x256xf32>
    tpu.vector_store %arg3[%c0_56, %c0_57, %c0_58], %100 {strides = array<i32>} : memref<2x3x256xf32, #tpu.memory_space<vmem>>, vector<1x3x256xf32>,
    %c1_59 = arith.constant 1 : index
    %c0_60 = arith.constant 0 : index
    %c0_61 = arith.constant 0 : index
    %101 = vector.load %arg1[%c1_59, %c0_60, %c0_61] : memref<2x31x256xf32, #tpu.memory_space<vmem>>, vector<1x31x256xf32>
    %102 = vector.shape_cast %101 : vector<1x31x256xf32> to vector<31x256xf32>
    %c0_62 = arith.constant 0 : index
    %c128_63 = arith.constant 128 : index
    %103 = vector.load %arg4[%c0_62, %c128_63] : memref<31x512xf32, #tpu.memory_space<vmem>>, vector<31x256xf32>
    tpu.vector_store %arg4[%c0_62, %c128_63], %102 {strides = array<i32>} : memref<31x512xf32, #tpu.memory_space<vmem>>, vector<31x256xf32>,
    %cst_64 = arith.constant 0.000000e+00 : f32
    %104 = vector.broadcast %cst_64 : f32 to vector<3x256xf32>
    %c0_65 = arith.constant 0 : index
    %c111_66 = arith.constant 111 : index
    %105 = vector.load %arg4[%c0_65, %c111_66] : memref<31x512xf32, #tpu.memory_space<vmem>>, vector<31x256xf32>
    %cst_67 = arith.constant 0.000000e+00 : f32
    %106 = vector.shape_cast %22 : vector<1x256xi1> to vector<1x256xi1>
    %107 = vector.broadcast %106 : vector<1x256xi1> to vector<31x256xi1>
    %108 = vector.broadcast %cst_67 : f32 to vector<31x256xf32>
    %109 = arith.select %107, %105, %108 : vector<31x256xi1>, vector<31x256xf32>
    %c0_68 = arith.constant 0 : index
    %c0_69 = arith.constant 0 : index
    %c0_70 = arith.constant 0 : index
    %110 = vector.load %arg2[%c0_68, %c0_69, %c0_70] : memref<9x3x31xf32, #tpu.memory_space<vmem>>, vector<1x3x31xf32>
    %111 = vector.shape_cast %110 : vector<1x3x31xf32> to vector<3x31xf32>
    %cst_71 = arith.constant dense<0.000000e+00> : vector<3x256xf32>
    %112 = tpu.matmul %111, %109, %cst_71 {dimension_numbers = #tpu.dot_dimension_numbers<[1], [0], [0], [1], [0, 0, 1, 1], [], []>} : vector<3x31xf32>, vector<31x256xf32>, vector<3x256xf32> -> vector<3x256xf32>
    %113 = arith.addf %104, %112 : vector<3x256xf32>
    %c0_72 = arith.constant 0 : index
    %c112_73 = arith.constant 112 : index
    %114 = vector.load %arg4[%c0_72, %c112_73] : memref<31x512xf32, #tpu.memory_space<vmem>>, vector<31x256xf32>
    %c1_74 = arith.constant 1 : index
    %c0_75 = arith.constant 0 : index
    %c0_76 = arith.constant 0 : index
    %115 = vector.load %arg2[%c1_74, %c0_75, %c0_76] : memref<9x3x31xf32, #tpu.memory_space<vmem>>, vector<1x3x31xf32>
    %116 = vector.shape_cast %115 : vector<1x3x31xf32> to vector<3x31xf32>
    %cst_77 = arith.constant dense<0.000000e+00> : vector<3x256xf32>
    %117 = tpu.matmul %116, %114, %cst_77 {dimension_numbers = #tpu.dot_dimension_numbers<[1], [0], [0], [1], [0, 0, 1, 1], [], []>} : vector<3x31xf32>, vector<31x256xf32>, vector<3x256xf32> -> vector<3x256xf32>
    %118 = arith.addf %113, %117 : vector<3x256xf32>
    %c0_78 = arith.constant 0 : index
    %c113_79 = arith.constant 113 : index
    %119 = vector.load %arg4[%c0_78, %c113_79] : memref<31x512xf32, #tpu.memory_space<vmem>>, vector<31x256xf32>
    %cst_80 = arith.constant 0.000000e+00 : f32
    %120 = vector.shape_cast %24 : vector<1x256xi1> to vector<1x256xi1>
    %121 = vector.broadcast %120 : vector<1x256xi1> to vector<31x256xi1>
    %122 = vector.broadcast %cst_80 : f32 to vector<31x256xf32>
    %123 = arith.select %121, %119, %122 : vector<31x256xi1>, vector<31x256xf32>
    %c2_81 = arith.constant 2 : index
    %c0_82 = arith.constant 0 : index
    %c0_83 = arith.constant 0 : index
    %124 = vector.load %arg2[%c2_81, %c0_82, %c0_83] : memref<9x3x31xf32, #tpu.memory_space<vmem>>, vector<1x3x31xf32>
    %125 = vector.shape_cast %124 : vector<1x3x31xf32> to vector<3x31xf32>
    %cst_84 = arith.constant dense<0.000000e+00> : vector<3x256xf32>
    %126 = tpu.matmul %125, %123, %cst_84 {dimension_numbers = #tpu.dot_dimension_numbers<[1], [0], [0], [1], [0, 0, 1, 1], [], []>} : vector<3x31xf32>, vector<31x256xf32>, vector<3x256xf32> -> vector<3x256xf32>
    %127 = arith.addf %118, %126 : vector<3x256xf32>
    %c0_85 = arith.constant 0 : index
    %c127_86 = arith.constant 127 : index
    %128 = vector.load %arg4[%c0_85, %c127_86] : memref<31x512xf32, #tpu.memory_space<vmem>>, vector<31x256xf32>
    %cst_87 = arith.constant 0.000000e+00 : f32
    %129 = vector.shape_cast %22 : vector<1x256xi1> to vector<1x256xi1>
    %130 = vector.broadcast %129 : vector<1x256xi1> to vector<31x256xi1>
    %131 = vector.broadcast %cst_87 : f32 to vector<31x256xf32>
    %132 = arith.select %130, %128, %131 : vector<31x256xi1>, vector<31x256xf32>
    %c3_88 = arith.constant 3 : index
    %c0_89 = arith.constant 0 : index
    %c0_90 = arith.constant 0 : index
    %133 = vector.load %arg2[%c3_88, %c0_89, %c0_90] : memref<9x3x31xf32, #tpu.memory_space<vmem>>, vector<1x3x31xf32>
    %134 = vector.shape_cast %133 : vector<1x3x31xf32> to vector<3x31xf32>
    %cst_91 = arith.constant dense<0.000000e+00> : vector<3x256xf32>
    %135 = tpu.matmul %134, %132, %cst_91 {dimension_numbers = #tpu.dot_dimension_numbers<[1], [0], [0], [1], [0, 0, 1, 1], [], []>} : vector<3x31xf32>, vector<31x256xf32>, vector<3x256xf32> -> vector<3x256xf32>
    %136 = arith.addf %127, %135 : vector<3x256xf32>
    %c0_92 = arith.constant 0 : index
    %c128_93 = arith.constant 128 : index
    %137 = vector.load %arg4[%c0_92, %c128_93] : memref<31x512xf32, #tpu.memory_space<vmem>>, vector<31x256xf32>
    %c4_94 = arith.constant 4 : index
    %c0_95 = arith.constant 0 : index
    %c0_96 = arith.constant 0 : index
    %138 = vector.load %arg2[%c4_94, %c0_95, %c0_96] : memref<9x3x31xf32, #tpu.memory_space<vmem>>, vector<1x3x31xf32>
    %139 = vector.shape_cast %138 : vector<1x3x31xf32> to vector<3x31xf32>
    %cst_97 = arith.constant dense<0.000000e+00> : vector<3x256xf32>
    %140 = tpu.matmul %139, %137, %cst_97 {dimension_numbers = #tpu.dot_dimension_numbers<[1], [0], [0], [1], [0, 0, 1, 1], [], []>} : vector<3x31xf32>, vector<31x256xf32>, vector<3x256xf32> -> vector<3x256xf32>
    %141 = arith.addf %136, %140 : vector<3x256xf32>
    %c0_98 = arith.constant 0 : index
    %c129_99 = arith.constant 129 : index
    %142 = vector.load %arg4[%c0_98, %c129_99] : memref<31x512xf32, #tpu.memory_space<vmem>>, vector<31x256xf32>
    %cst_100 = arith.constant 0.000000e+00 : f32
    %143 = vector.shape_cast %24 : vector<1x256xi1> to vector<1x256xi1>
    %144 = vector.broadcast %143 : vector<1x256xi1> to vector<31x256xi1>
    %145 = vector.broadcast %cst_100 : f32 to vector<31x256xf32>
    %146 = arith.select %144, %142, %145 : vector<31x256xi1>, vector<31x256xf32>
    %c5_101 = arith.constant 5 : index
    %c0_102 = arith.constant 0 : index
    %c0_103 = arith.constant 0 : index
    %147 = vector.load %arg2[%c5_101, %c0_102, %c0_103] : memref<9x3x31xf32, #tpu.memory_space<vmem>>, vector<1x3x31xf32>
    %148 = vector.shape_cast %147 : vector<1x3x31xf32> to vector<3x31xf32>
    %cst_104 = arith.constant dense<0.000000e+00> : vector<3x256xf32>
    %149 = tpu.matmul %148, %146, %cst_104 {dimension_numbers = #tpu.dot_dimension_numbers<[1], [0], [0], [1], [0, 0, 1, 1], [], []>} : vector<3x31xf32>, vector<31x256xf32>, vector<3x256xf32> -> vector<3x256xf32>
    %150 = arith.addf %141, %149 : vector<3x256xf32>
    %c0_105 = arith.constant 0 : index
    %c143_106 = arith.constant 143 : index
    %151 = vector.load %arg4[%c0_105, %c143_106] : memref<31x512xf32, #tpu.memory_space<vmem>>, vector<31x256xf32>
    %cst_107 = arith.constant 0.000000e+00 : f32
    %152 = vector.shape_cast %22 : vector<1x256xi1> to vector<1x256xi1>
    %153 = vector.broadcast %152 : vector<1x256xi1> to vector<31x256xi1>
    %154 = vector.broadcast %cst_107 : f32 to vector<31x256xf32>
    %155 = arith.select %153, %151, %154 : vector<31x256xi1>, vector<31x256xf32>
    %c6_108 = arith.constant 6 : index
    %c0_109 = arith.constant 0 : index
    %c0_110 = arith.constant 0 : index
    %156 = vector.load %arg2[%c6_108, %c0_109, %c0_110] : memref<9x3x31xf32, #tpu.memory_space<vmem>>, vector<1x3x31xf32>
    %157 = vector.shape_cast %156 : vector<1x3x31xf32> to vector<3x31xf32>
    %cst_111 = arith.constant dense<0.000000e+00> : vector<3x256xf32>
    %158 = tpu.matmul %157, %155, %cst_111 {dimension_numbers = #tpu.dot_dimension_numbers<[1], [0], [0], [1], [0, 0, 1, 1], [], []>} : vector<3x31xf32>, vector<31x256xf32>, vector<3x256xf32> -> vector<3x256xf32>
    %159 = arith.addf %150, %158 : vector<3x256xf32>
    %c0_112 = arith.constant 0 : index
    %c144_113 = arith.constant 144 : index
    %160 = vector.load %arg4[%c0_112, %c144_113] : memref<31x512xf32, #tpu.memory_space<vmem>>, vector<31x256xf32>
    %c7_114 = arith.constant 7 : index
    %c0_115 = arith.constant 0 : index
    %c0_116 = arith.constant 0 : index
    %161 = vector.load %arg2[%c7_114, %c0_115, %c0_116] : memref<9x3x31xf32, #tpu.memory_space<vmem>>, vector<1x3x31xf32>
    %162 = vector.shape_cast %161 : vector<1x3x31xf32> to vector<3x31xf32>
    %cst_117 = arith.constant dense<0.000000e+00> : vector<3x256xf32>
    %163 = tpu.matmul %162, %160, %cst_117 {dimension_numbers = #tpu.dot_dimension_numbers<[1], [0], [0], [1], [0, 0, 1, 1], [], []>} : vector<3x31xf32>, vector<31x256xf32>, vector<3x256xf32> -> vector<3x256xf32>
    %164 = arith.addf %159, %163 : vector<3x256xf32>
    %c0_118 = arith.constant 0 : index
    %c145_119 = arith.constant 145 : index
    %165 = vector.load %arg4[%c0_118, %c145_119] : memref<31x512xf32, #tpu.memory_space<vmem>>, vector<31x256xf32>
    %cst_120 = arith.constant 0.000000e+00 : f32
    %166 = vector.shape_cast %24 : vector<1x256xi1> to vector<1x256xi1>
    %167 = vector.broadcast %166 : vector<1x256xi1> to vector<31x256xi1>
    %168 = vector.broadcast %cst_120 : f32 to vector<31x256xf32>
    %169 = arith.select %167, %165, %168 : vector<31x256xi1>, vector<31x256xf32>
    %c8_121 = arith.constant 8 : index
    %c0_122 = arith.constant 0 : index
    %c0_123 = arith.constant 0 : index
    %170 = vector.load %arg2[%c8_121, %c0_122, %c0_123] : memref<9x3x31xf32, #tpu.memory_space<vmem>>, vector<1x3x31xf32>
    %171 = vector.shape_cast %170 : vector<1x3x31xf32> to vector<3x31xf32>
    %cst_124 = arith.constant dense<0.000000e+00> : vector<3x256xf32>
    %172 = tpu.matmul %171, %169, %cst_124 {dimension_numbers = #tpu.dot_dimension_numbers<[1], [0], [0], [1], [0, 0, 1, 1], [], []>} : vector<3x31xf32>, vector<31x256xf32>, vector<3x256xf32> -> vector<3x256xf32>
    %173 = arith.addf %164, %172 : vector<3x256xf32>
    %c1_125 = arith.constant 1 : index
    %c0_126 = arith.constant 0 : index
    %c0_127 = arith.constant 0 : index
    %174 = vector.load %arg3[%c1_125, %c0_126, %c0_127] : memref<2x3x256xf32, #tpu.memory_space<vmem>>, vector<1x3x256xf32>
    %175 = vector.shape_cast %174 : vector<1x3x256xf32> to vector<3x256xf32>
    %176 = vector.shape_cast %173 : vector<3x256xf32> to vector<1x3x256xf32>
    tpu.vector_store %arg3[%c1_125, %c0_126, %c0_127], %176 {strides = array<i32>} : memref<2x3x256xf32, #tpu.memory_space<vmem>>, vector<1x3x256xf32>,
    return
  }
  func.func @transform_0(%arg0: i32) -> (i32, i32, i32) {
    %c0_i32 = arith.constant 0 : i32
    %c0_i32_0 = arith.constant 0 : i32
    %c0_i32_1 = arith.constant 0 : i32
    return %arg0, %c0_i32, %c0_i32_0 : i32, i32, i32
  }
  func.func @transform_1(%arg0: i32) -> (i32, i32, i32) {
    %c0_i32 = arith.constant 0 : i32
    %c0_i32_0 = arith.constant 0 : i32
    %c0_i32_1 = arith.constant 0 : i32
    %c0_i32_2 = arith.constant 0 : i32
    return %c0_i32, %c0_i32_0, %c0_i32_1 : i32, i32, i32
  }
  func.func @transform_2(%arg0: i32) -> (i32, i32, i32) {
    %c0_i32 = arith.constant 0 : i32
    %c0_i32_0 = arith.constant 0 : i32
    %c0_i32_1 = arith.constant 0 : i32
    return %arg0, %c0_i32, %c0_i32_0 : i32, i32, i32
  }
}

</mosaic_0001>

<bundles_post_ra>
// kernel: revert_net_forward.1
= control target key start
LH: loop header
LB: loop body
LE: loop exit
PB: predicated region body
PF: predicated region fallthrough
CT: control target
= control target key end

     0   :  { %s2522_s9 = smov 0   ;;  %s3524_s0 = inlined_call_operand.vmem [shape: f32[4,31,256], index: 0, kind: input, shape index: {}]   ;;  %s3525_s1 = inlined_call_operand.vmem [shape: f32[9,3,31], index: 1, kind: input, shape index: {}]   ;;  %s3526_s2 = inlined_call_operand.vmem [shape: f32[4,3,256], index: 2, kind: output, shape index: {}]  }
   0x1 LB: > { %s2062_s10 = sadd.s32 4294967295, %s2496_s9   ;;  %p2066_p0 = scmp.ge.s32.totalorder %s2496_s9, 1  ;;  %s2496_s9 = sphi %s2522_s9, %s12_s9  }
   0x2   : > { %p114_p1 = scmp.lt.s32.totalorder %s2496_s9, 3 }
   0x4   : > { %p115_p2 = pnand %p2066_p0, %p114_p1 }
   0x5   : > { %s2067_s11 = sshll.u32 (!%p115_p2), %s2062_s10, 1  ;;  %s2499_s12 = smov (!%p115_p2), 17  }
   0x6   : > { %118 = sbr.rel (%p115_p2) target bundleno = 658 (0x292), region = 28  ;;  %p139_p3 = scmp.lt.s32.totalorder (!%p115_p2), %s2067_s11, 3 }
   0x7   : > { %s2500_s17 = smov (!%p115_p2), 16   ;;  %s2501_s18 = smov (!%p115_p2), 15  }
   0x8   : > { %s2502_s19 = smov (!%p115_p2), 1   ;;  %s2503_s20 = smov (!%p115_p2), 127  }
   0x9   : > { %s2504_s21 = smov (!%p115_p2), 113   ;;  %s2505_s22 = smov (!%p115_p2), 112  }
   0xa   : > { %s2506_s23 = smov (!%p115_p2), 111  }
   0xb   : > { %v2498_v0 = vmov 0.0   ;;  %s3536_s11 = smov (!%p139_p3, %s2067_s11), 3  ;;  %v160_v29 = vlaneseq  ;;  %vm259_vm1 = vcmask 138240   ;;  %vm330_vm2 = vcmask 1046528  }
   0xc   : > { %152 = vst [vmem:[#allocation2 + $0x58] sm:$0xff] %v2498_v0  ;;  %2264 = vrot.lane.b32.xlu0 %v2498_v0, %s2499_s12  ;;  %s2244_s13 = sshll.u32 %s3536_s11, 6  ;;  %vm311_vm4 = vcmask 130048   ;;  %vm452_vm7 = vcmask 121856   ;;  %vm554_vm8 = vcmask 7168   ;;  %vm326_vm9 = vcmask 252928  }
   0xd   : > { %155 = vst [vmem:[#allocation2 + $0x60] sm:$0x7f] %v2498_v0  ;;  %s2540_s16 = scalar_lea.vmem %s3524_s0, %s2244_s13  ;;  %v2676_v30 = vand.u32 127, %v160_v29  ;;  %vm731_vm10 = vcmask 1039360   ;;  %vm833_vm11 = vcmask 924672   ;;  %vm937_vm12 = vcmask 916480  }
   0xe   : > { %v2543_v1 = vld [vmem:[%s2540_s16 + $0x8] sm:$0xff]  ;;  %159 = vst [vmem:[#allocation2 + $0x10] sm:$0x7f] %v2498_v0  ;;  %v2549_v2 = vld [vmem:[%s2540_s16] sm:$0xff]  ;;  %v198_v3 = vld [vmem:[%s2540_s16 + $0x38] sm:$0x7f] }
   0xf   : > { %239 = vrot.lane.b32.xlu1 %v2543_v1, %s2499_s12  ;;  %v197_v4 = vld [vmem:[%s2540_s16 + $0x30] sm:$0x7f]  ;;  %206 = vst [vmem:[#allocation2 + $0x38] sm:$0x7f] %v198_v3  ;;  %v2563_v8 = vld [vmem:[%s2540_s16 + $0x20] sm:$0xff]  ;;  %v2568_v9 = vld [vmem:[%s2540_s16 + $0x18] sm:$0xff]  ;;  %v2273_v13 = vpack.i.bf16 %v2549_v2, %v2498_v0 }
  0x10   : > { %205 = vst [vmem:[#allocation2 + $0x70] sm:$0x7f] %v197_v4  ;;  %v2557_v7 = vld [vmem:[%s2540_s16 + $0x10] sm:$0xff]  ;;  %v2571_v10 = vld [vmem:[%s2540_s16 + $0x28] sm:$0xff]  ;;  %v2278_v15 = vpack.i.bf16 0.0, %v2543_v1  ;;  %v2288_v16 = vpack.i.bf16 %v2563_v8, %v2498_v0  ;;  %v2616_v18 = vld [vmem:[%s2540_s16 + $0x40] sm:$0xff] }
  0x11   : > { %v2283_v14 = vpack.i.bf16 %v2568_v9, %v2557_v7  ;;  %1119 = vst [vmem:[#allocation2 + $0x8] sm:$0xff] %v2616_v18  ;;  %v2626_v19 = vld [vmem:[%s2540_s16 + $0x50] sm:$0xff]  ;;  %v2634_v20 = vld [vmem:[%s2540_s16 + $0x48] sm:$0xff]  ;;  %v2638_v21 = vld [vmem:[%s2540_s16 + $0x60] sm:$0xff]  ;;  %v167_v32 = vand.u32 15, %v2676_v30  ;;  %v2711_v46 = vadd.s32 128, %v2676_v30 }
  0x12   : > { %1121 = vst [vmem:[#allocation2 + $0x40] sm:$0xff] %v2626_v19  ;;  %v2646_v22 = vld [vmem:[%s2540_s16 + $0x68] sm:$0xff]  ;;  %v2652_v23 = vld [vmem:[%s2540_s16 + $0x58] sm:$0xff]  ;;  %v2159_v25 = vld [vmem:[%s2540_s16 + $0x70] sm:$0x7f]  ;;  %vm1025_vm13 = vcmask 908288  }
  0x13   : > { %1120 = vst [vmem:[#allocation2 + $0x18] sm:$0xff] %v2634_v20  ;;  %v2160_v27 = vld [vmem:[%s2540_s16 + $0x78] sm:$0x7f]  ;;  %vm2687_vm0 = vcmp.ge.s32.totalorder %v167_v32, 1  ;;  %v174_v53 = vand.u32 15, %v2711_v46  ;;  %vm2809_vm5 = vcmp.le.s32.totalorder %v167_v32, 14 }
  0x14   : > { %237 = vrot.lane.b32.xlu0 %v2549_v2, %s2499_s12  ;;  %v216_v5 = vld [vmem:[#allocation2 + $0x60] sm:$0x7f]  ;;  %1123 = vst [vmem:[#allocation2 + $0x48] sm:$0xff] %v2638_v21  ;;  %s2245_s6 = sshll.u32 %s3536_s11, 3  ;;  %vm1106_vm14 = vcmask 1043456  }
  0x15   : > { %v2268_v6 = vpack.i.bf16 %v216_v5, %v2498_v0  ;;  %v2293_v17 = vpack.i.bf16 %v216_v5, %v2571_v10  ;;  %1124 = vst [vmem:[#allocation2 + $0x68] sm:$0xff] %v2646_v22  ;;  %v694_v35 = vld [vmem:[#allocation2 + $0x10] sm:$0x7f]  ;;  %vm2733_vm3 = vcmp.ge.s32.totalorder %v174_v53, 1  ;;  %v2338_v5 = vpack.i.bf16 %v2543_v1, %v2549_v2  ;;  %s3515_s10 = scalar_lea.vmem %s3526_s2, %s2245_s6 }
  0x16   : > { %v2577_v11 = vld [vmem:[#allocation2 + $0x38] sm:$0x7f]  ;;  %1122 = vst [vmem:[#allocation2 + $0x78] sm:$0xff] %v2652_v23  ;;  %v2695_v40 = vpack.i.bf16 %v694_v35, %v2498_v0  ;;  %vm2815_vm6 = vcmp.le.s32.totalorder %v174_v53, 14 }
  0x17   : > { %2269 = vrot.lane.b32.xlu2 %v2268_v6, %s2499_s12  ;;  %243 = vrot.lane.b32.xlu1 %v2557_v7, %s2499_s12  ;;  %v2581_v12 = vld [vmem:[#allocation2 + $0x70] sm:$0x7f]  ;;  %v2660_v26 = vld [vmem:[#allocation2 + $0x38] sm:$0x7f] }
  0x18   : > { %v2655_v24 = vld [vmem:[#allocation2 + $0x70] sm:$0x7f]  ;;  %1126 = vst [vmem:[#allocation2 + $0x38] sm:$0x7f] %v2160_v27 }
  0x19   : > { %1125 = vst [vmem:[#allocation2 + $0x70] sm:$0x7f] %v2159_v25 }
  0x1c   : > { %249 = vrot.lane.b32.xlu0 %v2563_v8, %s2499_s12 }
  0x1f   : > { %245 = vrot.lane.b32.xlu2 %v2568_v9, %s2499_s12  ;;  %251 = vrot.lane.b32.xlu1 %v2571_v10, %s2499_s12 }
  0x24   : > { %257 = vrot.lane.b32.xlu0 %v2577_v11, %s2499_s12 }
  0x27   : > { %255 = vrot.lane.b32.xlu2 %v2581_v12, %s2499_s12  ;;  %2274 = vrot.lane.b32.xlu1 %v2273_v13, %s2500_s17 }
  0x2c   : > { %2284 = vrot.lane.b32.xlu0 %v2283_v14, %s2500_s17 }
  0x2f   : > { %2279 = vrot.lane.b32.xlu2 %v2278_v15, %s2500_s17  ;;  %2289 = vrot.lane.b32.xlu1 %v2288_v16, %s2500_s17 }
  0x34   : > { %307 = vrot.lane.b32.xlu0 %v2581_v12, %s2500_s17 }
  0x37   : > { %2294 = vrot.lane.b32.xlu2 %v2293_v17, %s2500_s17  ;;  %309 = vrot.lane.b32.xlu1 %v2577_v11, %s2500_s17  ;;  %v2343_v17 = vpack.i.bf16 %v2557_v7, %v2498_v0 }
  0x3c   : > { %430 = vrot.lane.b32.xlu0 %v2549_v2, %s2501_s18 }
  0x3f   : > { %2299 = vrot.lane.b32.xlu2 %v2498_v0, %s2501_s18  ;;  %432 = vrot.lane.b32.xlu1 %v2543_v1, %s2501_s18 }
  0x44   : > { %438 = vrot.lane.b32.xlu0 %v2568_v9, %s2501_s18 }
  0x47   : > { %436 = vrot.lane.b32.xlu2 %v2557_v7, %s2501_s18  ;;  %2304 = vrot.lane.b32.xlu1 %v2268_v6, %s2501_s18 }
  0x4c   : > { %444 = vrot.lane.b32.xlu0 %v2571_v10, %s2501_s18 }
  0x4f   : > { %442 = vrot.lane.b32.xlu2 %v2563_v8, %s2501_s18  ;;  %448 = vrot.lane.b32.xlu1 %v2581_v12, %s2501_s18 }
  0x54   : > { %2309 = vrot.lane.b32.xlu0 %v2498_v0, %s2502_s19 }
  0x57   : > { %450 = vrot.lane.b32.xlu2 %v2577_v11, %s2501_s18  ;;  %532 = vrot.lane.b32.xlu1 %v2549_v2, %s2502_s19 }
  0x5c   : > { %538 = vrot.lane.b32.xlu0 %v2557_v7, %s2502_s19 }
  0x5f   : > { %534 = vrot.lane.b32.xlu2 %v2543_v1, %s2502_s19  ;;  %540 = vrot.lane.b32.xlu1 %v2568_v9, %s2502_s19 }
  0x64   : > { %544 = vrot.lane.b32.xlu0 %v2563_v8, %s2502_s19 }
  0x67   : > { %2314 = vrot.lane.b32.xlu2 %v2268_v6, %s2502_s19  ;;  %546 = vrot.lane.b32.xlu1 %v2571_v10, %s2502_s19 }
  0x6c   : > { %552 = vrot.lane.b32.xlu0 %v2577_v11, %s2502_s19 }
  0x6f   : > { %550 = vrot.lane.b32.xlu2 %v2581_v12, %s2502_s19  ;;  %707 = vrot.lane.b32.xlu1 %v2549_v2, %s2503_s20 }
  0x71   : > { %v2270_v28 = vpop.permute.xlu2 %2269 }
  0x72   : > { %v2272_v33 = vunpack.i.h.bf16 %v2270_v28  ;;  %v2271_v45 = vunpack.i.l.bf16 %v2270_v28 }
  0x74   : > { %2319 = vrot.lane.b32.xlu0 %v2498_v0, %s2503_s20 }
  0x77   : > { %709 = vrot.lane.b32.xlu2 %v2543_v1, %s2503_s20  ;;  %713 = vrot.lane.b32.xlu1 %v2557_v7, %s2503_s20 }
  0x79   : > { %v246_v31 = vpop.permute.xlu2 %245 }
  0x7c   : > { %719 = vrot.lane.b32.xlu0 %v2563_v8, %s2503_s20 }
  0x7e   : > { %v2265_v34 = vpop.permute.xlu0 %2264 }
  0x7f   : > { %715 = vrot.lane.b32.xlu2 %v2568_v9, %s2503_s20  ;;  %721 = vrot.lane.b32.xlu1 %v2571_v10, %s2503_s20  ;;  %v2267_v48 = vunpack.i.h.bf16 %v2265_v34  ;;  %v2266_v50 = vunpack.i.l.bf16 %v2265_v34 }
  0x81   : > { %v256_v37 = vpop.permute.xlu2 %255  ;;  %v240_v39 = vpop.permute.xlu1 %239 }
  0x82   : > { %v266_v38 = vsel %vm259_vm1, %v2272_v33, %v256_v37  ;;  %v2353_v33 = vpack.i.bf16 %v2571_v10, %v2563_v8 }
  0x83   : > { %v282_v41 = vsel %vm2687_vm0, %v266_v38, 0.0 }
  0x84   : > { %725 = vrot.lane.b32.xlu0 %v2655_v24, %s2503_s20  ;;  %2078 = vmatpush.msk.msra.mxu2 %vm330_vm2, %v282_v41 }
  0x86   : > { %v238_v42 = vpop.permute.xlu0 %237 }
  0x87   : > { %2324 = vrot.lane.b32.xlu2 %v2695_v40, %s2503_s20  ;;  %727 = vrot.lane.b32.xlu1 %v2660_v26, %s2503_s20  ;;  %v260_v55 = vsel %vm259_vm1, %v2266_v50, %v238_v42  ;;  %v261_v4 = vsel %vm259_vm1, %v238_v42, %v240_v39  ;;  %v2348_v42 = vpack.i.bf16 0.0, %v2568_v9 }
  0x89   : > { %v2706_v43 = vpop.permute.xlu2 %2279  ;;  %v244_v44 = vpop.permute.xlu1 %243 }
  0x8a   : > { %v262_v51 = vsel %vm259_vm1, %v2267_v48, %v244_v44  ;;  %v263_v63 = vsel %vm259_vm1, %v244_v44, %v246_v31  ;;  %v2282_v27 = vunpack.i.h.bf16 %v2706_v43  ;;  %v2281_v48 = vunpack.i.l.bf16 %v2706_v43 }
  0x8c   : > { %811 = vrot.lane.b32.xlu0 %v2543_v1, %s2504_s21 }
  0x8e   : > { %v250_v47 = vpop.permute.xlu0 %249 }
  0x8f   : > { %v264_v49 = vsel %vm259_vm1, %v2271_v45, %v250_v47  ;;  %809 = vrot.lane.b32.xlu2 %v2549_v2, %s2504_s21  ;;  %2329 = vrot.lane.b32.xlu1 %v2498_v0, %s2504_s21 }
  0x90   : > { %2079 = vmatpush.msk.msra.mxu2 %vm2687_vm0, %v264_v49 }
  0x91   : > { %v2721_v52 = vpop.permute.xlu2 %2294  ;;  %v252_v54 = vpop.permute.xlu1 %251 }
  0x92   : > { %2080 = vmatpush.msk.msra.mxu2 %vm2687_vm0, %v262_v51  ;;  %v265_v61 = vsel %vm259_vm1, %v250_v47, %v252_v54  ;;  %v2297_v13 = vunpack.i.h.bf16 %v2721_v52  ;;  %v2296_v38 = vunpack.i.l.bf16 %v2721_v52 }
  0x94   : > { %817 = vrot.lane.b32.xlu0 %v2568_v9, %s2504_s21  ;;  %2081 = vmatpush.msk.msra.mxu2 %vm2687_vm0, %v260_v55 }
  0x96   : > { %v258_v57 = vpop.permute.xlu0 %257 }
  0x97   : > { %v267_v58 = vsel %vm259_vm1, %v256_v37, %v258_v57  ;;  %815 = vrot.lane.b32.xlu2 %v2557_v7, %s2504_s21  ;;  %821 = vrot.lane.b32.xlu1 %v2563_v8, %s2504_s21 }
  0x98   : > { %v283_v59 = vsel %vm2733_vm3, %v267_v58, 0.0 }
  0x99   : > { %2083 = vmatpush.msk.msra.mxu3 %vm330_vm2, %v283_v59  ;;  %v2745_v60 = vpop.permute.xlu2 %2299  ;;  %v2275_v62 = vpop.permute.xlu1 %2274 }
  0x9a   : > { %v2277_v34 = vunpack.i.h.bf16 %v2275_v62  ;;  %v2276_v35 = vunpack.i.l.bf16 %v2275_v62  ;;  %v2302_v30 = vunpack.i.h.bf16 %v2745_v60 }
  0x9b   : > { %2084 = vmatpush.msk.msra.mxu3 %vm2733_vm3, %v265_v61 }
  0x9c   : > { %2334 = vrot.lane.b32.xlu0 %v2695_v40, %s2504_s21  ;;  %v312_v47 = vsel %vm311_vm4, %v2276_v35, %v2277_v34  ;;  %v313_v54 = vsel %vm311_vm4, %v2277_v34, %v2281_v48 }
  0x9d   : > { %2085 = vmatpush.msk.msra.mxu3 %vm2733_vm3, %v263_v63 }
  0x9e   : > { %v2285_v3 = vpop.permute.xlu0 %2284 }
  0x9f   : > { %2086 = vmatpush.msk.msra.mxu3 %vm2733_vm3, %v261_v4  ;;  %823 = vrot.lane.b32.xlu2 %v2571_v10, %s2504_s21  ;;  %v2286_v28 = vunpack.i.l.bf16 %v2285_v3  ;;  %v2287_v44 = vunpack.i.h.bf16 %v2285_v3 }
  0xa0   : > { %827 = vrot.lane.b32.xlu1 %v2655_v24, %s2504_s21 }
  0xa1   : > { %v2764_v6 = vpop.permute.xlu2 %436  ;;  %v2290_v14 = vpop.permute.xlu1 %2289  ;;  %v314_v41 = vsel %vm311_vm4, %v2282_v27, %v2286_v28  ;;  %v315_v51 = vsel %vm311_vm4, %v2286_v28, %v2287_v44 }
  0xa2   : > { %v2292_v15 = vunpack.i.h.bf16 %v2290_v14  ;;  %v2291_v16 = vunpack.i.l.bf16 %v2290_v14  ;;  %v455_v27 = vsel %vm452_vm7, %v2302_v30, %v2764_v6  ;;  %v2937_v30 = vld [vmem:[#allocation2 + $0x38] sm:$0x7f] }
  0xa4   : > { %2339 = vrot.lane.b32.xlu0 %v2338_v5, %s2505_s22  ;;  %v316_v31 = vsel %vm311_vm4, %v2291_v16, %v2292_v15  ;;  %v317_v50 = vsel %vm311_vm4, %v2292_v15, %v2296_v38  ;;  %v2301_v16 = vunpack.i.l.bf16 %v2745_v60 }
  0xa6   : > { %v308_v25 = vpop.permute.xlu0 %307 }
  0xa7   : > { %v318_v29 = vsel %vm311_vm4, %v2297_v13, %v308_v25  ;;  %829 = vrot.lane.b32.xlu2 %v2660_v26, %s2504_s21 }
  0xa8   : > { %2074 = vmatpush.msk.msra.mxu0 %vm330_vm2, %v318_v29  ;;  %2344 = vrot.lane.b32.xlu1 %v2343_v17, %s2505_s22 }
  0xa9   : > { %v443_v37 = vpop.permute.xlu2 %442  ;;  %v310_v39 = vpop.permute.xlu1 %309 }
  0xaa   : > { %348 = vmatpush.msra.mxu0 %v316_v31  ;;  %v319_v45 = vsel %vm311_vm4, %v308_v25, %v310_v39 }
  0xab   : > { %2076 = vmatpush.msk.msra.mxu1 %vm330_vm2, %v319_v45  ;;  %v2881_v45 = vld [vmem:[#allocation2 + $0x60] sm:$0x7f] }
  0xac   : > { %2354 = vrot.lane.b32.xlu0 %v2353_v33, %s2505_s22  ;;  %349 = vmatpush.msra.mxu0 %v314_v41 }
  0xad   : > { %368 = vmatpush.msra.mxu1 %v317_v50  ;;  %v284_v50 = vld [vmem:[%s3525_s1] sm:$0x7] }
  0xae   : > { %v431_v49 = vpop.permute.xlu0 %430  ;;  %350 = vmatpush.msra.mxu0 %v312_v47  ;;  %2082 = vmatmul.msk.f32.vlgmr.msra.gmra.mxu2 %vm326_vm9, %v284_v50 }
  0xaf   : > { %2349 = vrot.lane.b32.xlu2 %v2348_v42, %s2505_s22  ;;  %369 = vmatpush.msra.mxu1 %v315_v51  ;;  %v453_v33 = vsel %vm452_vm7, %v2301_v16, %v431_v49 }
  0xb0   : > { %2359 = vrot.lane.b32.xlu1 %v2695_v40, %s2505_s22  ;;  %2087 = vmatmul.msk.f32.vlgmr.msra.gmra.mxu3 %vm326_vm9, %v284_v50 }
  0xb1   : > { %v451_v52 = vpop.permute.xlu2 %450  ;;  %v433_v55 = vpop.permute.xlu1 %432  ;;  %370 = vmatpush.msra.mxu1 %v313_v54 }
  0xb4   : > { %933 = vrot.lane.b32.xlu0 %v2660_v26, %s2505_s22 }
  0xb6   : > { %v439_v43 = vpop.permute.xlu0 %438 }
  0xb7   : > { %931 = vrot.lane.b32.xlu2 %v2655_v24, %s2505_s22  ;;  %v456_v60 = vsel %vm452_vm7, %v2764_v6, %v439_v43  ;;  %v454_v6 = vsel %vm452_vm7, %v431_v49, %v433_v55  ;;  %v2890_v49 = vpack.i.bf16 %v2881_v45, %v2498_v0 }
  0xb8   : > { %1001 = vrot.lane.b32.xlu1 %v2549_v2, %s2506_s23 }
  0xb9   : > { %v2799_v57 = vpop.permute.xlu2 %534  ;;  %v2305_v58 = vpop.permute.xlu1 %2304 }
  0xba   : > { %v2307_v62 = vunpack.i.h.bf16 %v2305_v58  ;;  %v2306_v4 = vunpack.i.l.bf16 %v2305_v58 }
  0xbc   : > { %2364 = vrot.lane.b32.xlu0 %v2498_v0, %s2506_s23  ;;  %v457_v17 = vsel %vm452_vm7, %v2306_v4, %v443_v37  ;;  %v2921_v4 = vld [vmem:[#allocation2 + $0x70] sm:$0x7f] }
  0xbe   : > { %v445_v59 = vpop.permute.xlu0 %444 }
  0xbf   : > { %1003 = vrot.lane.b32.xlu2 %v2543_v1, %s2506_s23  ;;  %v458_v25 = vsel %vm452_vm7, %v443_v37, %v445_v59 }
  0xc0   : > { %1007 = vrot.lane.b32.xlu1 %v2557_v7, %s2506_s23 }
  0xc1   : > { %v2315_v61 = vpop.permute.xlu2 %2314  ;;  %v449_v5 = vpop.permute.xlu1 %448 }
  0xc2   : > { %v459_v13 = vsel %vm452_vm7, %v2307_v62, %v449_v5  ;;  %v460_v14 = vsel %vm452_vm7, %v449_v5, %v451_v52  ;;  %v2317_v53 = vunpack.i.h.bf16 %v2315_v61  ;;  %v2383_v5 = vpack.i.bf16 %v2616_v18, %v2498_v0 }
  0xc3   : > { %v475_v32 = vsel %vm2809_vm5, %v459_v13, 0.0  ;;  %v476_v46 = vsel %vm2815_vm6, %v460_v14, 0.0 }
  0xc4   : > { %1013 = vrot.lane.b32.xlu0 %v2563_v8, %s2506_s23  ;;  %2089 = vmatpush.msk.msrb.mxu0 %vm330_vm2, %v475_v32  ;;  %v2388_v32 = vpack.i.bf16 0.0, %v2634_v20 }
  0xc5   : > { %2094 = vmatpush.msk.msrb.mxu1 %vm330_vm2, %v476_v46 }
  0xc6   : > { %v2310_v15 = vpop.permute.xlu0 %2309  ;;  %2090 = vmatpush.msk.msrb.mxu0 %vm2809_vm5, %v457_v17 }
  0xc7   : > { %1009 = vrot.lane.b32.xlu2 %v2568_v9, %s2506_s23  ;;  %2095 = vmatpush.msk.msrb.mxu1 %vm2815_vm6, %v458_v25  ;;  %v2312_v41 = vunpack.i.h.bf16 %v2310_v15 }
  0xc8   : > { %1015 = vrot.lane.b32.xlu1 %v2571_v10, %s2506_s23  ;;  %2091 = vmatpush.msk.msrb.mxu0 %vm2809_vm5, %v455_v27 }
  0xc9   : > { %v551_v28 = vpop.permute.xlu2 %550  ;;  %2096 = vmatpush.msk.msrb.mxu1 %vm2815_vm6, %v456_v60  ;;  %v533_v31 = vpop.permute.xlu1 %532 }
  0xca   : > { %v561_v29 = vsel %vm554_vm8, %v2317_v53, %v551_v28  ;;  %2092 = vmatpush.msk.msrb.mxu0 %vm2809_vm5, %v453_v33  ;;  %v556_v62 = vsel %vm554_vm8, %v533_v31, %v2799_v57  ;;  %v2073_v57 = vld [vmem:[%s3525_s1 + $0x4] sm:$0x7]  ;;  %v2951_v53 = vpack.i.bf16 %v2638_v21, %v2498_v0 }
  0xcb   : > { %v577_v34 = vsel %vm2687_vm0, %v561_v29, 0.0  ;;  %2097 = vmatpush.msk.msrb.mxu1 %vm2815_vm6, %v454_v6  ;;  %2075 = vmatmul.msk.f32.vlgmr.msra.gmra.mxu0 %vm326_vm9, %v2073_v57 }
  0xcc   : > { %1019 = vrot.lane.b32.xlu0 %v2655_v24, %s2506_s23  ;;  %2100 = vmatpush.msk.msrb.mxu2 %vm330_vm2, %v577_v34  ;;  %v2316_v24 = vunpack.i.l.bf16 %v2315_v61 }
  0xcd   : > { %2077 = vmatmul.msk.f32.vlgmr.msra.gmra.mxu1 %vm326_vm9, %v2073_v57  ;;  %2111 = vmatpush.msk.msra.mxu0 %vm330_vm2, %v2581_v12 }
  0xce   : > { %v539_v35 = vpop.permute.xlu0 %538  ;;  %2113 = vmatpush.msk.msra.mxu1 %vm330_vm2, %v2577_v11 }
  0xcf   : > { %2369 = vrot.lane.b32.xlu2 %v2695_v40, %s2506_s23  ;;  %v2311_v40 = vunpack.i.l.bf16 %v2310_v15  ;;  %654 = vmatpush.msra.mxu0 %v2563_v8  ;;  %v2088_v8 = vld [vmem:[%s3525_s1 + $0x8] sm:$0x7] }
  0xd0   : > { %1021 = vrot.lane.b32.xlu1 %v2660_v26, %s2506_s23  ;;  %v557_v26 = vsel %vm554_vm8, %v2312_v41, %v539_v35  ;;  %674 = vmatpush.msra.mxu1 %v2571_v10  ;;  %v2393_v10 = vpack.i.bf16 %v2652_v23, %v2626_v19 }
  0xd1   : > { %v2865_v37 = vpop.permute.xlu2 %709  ;;  %v541_v38 = vpop.permute.xlu1 %540  ;;  %v555_v48 = vsel %vm554_vm8, %v2311_v40, %v533_v31  ;;  %655 = vmatpush.msra.mxu0 %v2557_v7  ;;  %v2099_v40 = vld [vmem:[%s3525_s1 + $0xc] sm:$0x7] }
  0xd2   : > { %v558_v59 = vsel %vm554_vm8, %v539_v35, %v541_v38  ;;  %675 = vmatpush.msra.mxu1 %v2568_v9  ;;  %v2403_v9 = vpack.i.bf16 %v2881_v45, %v2646_v22 }
  0xd3   : > { %656 = vmatpush.msra.mxu0 %v2549_v2 }
  0xd4   : > { %1153 = vrot.lane.b32.xlu0 %v2616_v18, %s2499_s12  ;;  %676 = vmatpush.msra.mxu1 %v2543_v1 }
  0xd5   : > { %2098 = vmatmul.msk.f32.vlgmr.msrb.gmra.mxu1 %vm326_vm9, %v2088_v8  ;;  %2093 = vmatmul.msk.f32.vlgmr.msrb.gmra.mxu0 %vm326_vm9, %v2088_v8 }
  0xd6   : > { %v545_v39 = vpop.permute.xlu0 %544 }
  0xd7   : > { %v559_v42 = vsel %vm554_vm8, %v2316_v24, %v545_v39  ;;  %2374 = vrot.lane.b32.xlu2 %v2498_v0, %s2499_s12 }
  0xd8   : > { %2101 = vmatpush.msk.msrb.mxu2 %vm2687_vm0, %v559_v42  ;;  %1155 = vrot.lane.b32.xlu1 %v2634_v20, %s2499_s12 }
  0xd9   : > { %v2877_v44 = vpop.permute.xlu2 %715  ;;  %v547_v47 = vpop.permute.xlu1 %546 }
  0xda   : > { %2102 = vmatpush.msk.msrb.mxu2 %vm2687_vm0, %v557_v26  ;;  %v560_v43 = vsel %vm554_vm8, %v545_v39, %v547_v47 }
  0xdc   : > { %2103 = vmatpush.msk.msrb.mxu2 %vm2687_vm0, %v555_v48  ;;  %1161 = vrot.lane.b32.xlu0 %v2652_v23, %s2499_s12 }
  0xdd   : > { %2104 = vmatmul.msk.f32.vlgmr.msrb.gmra.mxu2 %vm326_vm9, %v2099_v40 }
  0xde   : > { %v553_v51 = vpop.permute.xlu0 %552 }
  0xdf   : > { %v562_v52 = vsel %vm554_vm8, %v551_v28, %v553_v51  ;;  %1159 = vrot.lane.b32.xlu2 %v2626_v19, %s2499_s12 }
  0xe0   : > { %v578_v54 = vsel %vm2733_vm3, %v562_v52, 0.0  ;;  %2379 = vrot.lane.b32.xlu1 %v2890_v49, %s2499_s12 }
  0xe1   : > { %2105 = vmatpush.msk.msrb.mxu3 %vm330_vm2, %v578_v54  ;;  %v2905_v55 = vpop.permute.xlu2 %2324  ;;  %v2908_v58 = vpop.permute.xlu1 %707 }
  0xe2   : > { %v2327_v15 = vunpack.i.h.bf16 %v2905_v55  ;;  %v2326_v16 = vunpack.i.l.bf16 %v2905_v55  ;;  %v732_v38 = vsel %vm731_vm10, %v2908_v58, %v2865_v37 }
  0xe3   : > { %2106 = vmatpush.msk.msrb.mxu3 %vm2733_vm3, %v560_v43 }
  0xe4   : > { %1167 = vrot.lane.b32.xlu0 %v2646_v22, %s2499_s12 }
  0xe5   : > { %2107 = vmatpush.msk.msrb.mxu3 %vm2733_vm3, %v558_v59 }
  0xe6   : > { %v2917_v61 = vpop.permute.xlu0 %2319 }
  0xe7   : > { %2108 = vmatpush.msk.msrb.mxu3 %vm2733_vm3, %v556_v62  ;;  %1165 = vrot.lane.b32.xlu2 %v2638_v21, %s2499_s12  ;;  %v2322_v2 = vunpack.i.h.bf16 %v2917_v61  ;;  %v2321_v31 = vunpack.i.l.bf16 %v2917_v61 }
  0xe8   : > { %1171 = vrot.lane.b32.xlu1 %v2921_v4, %s2499_s12  ;;  %2109 = vmatmul.msk.f32.vlgmr.msrb.gmra.mxu3 %vm326_vm9, %v2099_v40 }
  0xe9   : > { %v2931_v13 = vpop.permute.xlu2 %809  ;;  %v714_v14 = vpop.permute.xlu1 %713  ;;  %v735_v35 = vsel %vm731_vm10, %v2877_v44, %v2322_v2  ;;  %v733_v41 = vsel %vm731_vm10, %v2865_v37, %v2321_v31 }
  0xea   : > { %v734_v6 = vsel %vm731_vm10, %v714_v14, %v2877_v44 }
  0xec   : > { %2384 = vrot.lane.b32.xlu0 %v2383_v5, %s2500_s17 }
  0xee   : > { %v720_v46 = vpop.permute.xlu0 %719 }
  0xef   : > { %1173 = vrot.lane.b32.xlu2 %v2937_v30, %s2499_s12 }
  0xf0   : > { %2389 = vrot.lane.b32.xlu1 %v2388_v32, %s2500_s17 }
  0xf1   : > { %v2957_v11 = vpop.permute.xlu2 %815  ;;  %v722_v12 = vpop.permute.xlu1 %721 }
  0xf2   : > { %v736_v33 = vsel %vm731_vm10, %v720_v46, %v722_v12  ;;  %v737_v34 = vsel %vm731_vm10, %v722_v12, %v2326_v16 }
  0xf4   : > { %2399 = vrot.lane.b32.xlu0 %v2951_v53, %s2500_s17 }
  0xf6   : > { %v726_v7 = vpop.permute.xlu0 %725 }
  0xf7   : > { %2394 = vrot.lane.b32.xlu2 %v2393_v10, %s2500_s17 }
  0xf8   : > { %2404 = vrot.lane.b32.xlu1 %v2403_v9, %s2500_s17 }
  0xf9   : > { %v2976_v1 = vpop.permute.xlu2 %823  ;;  %v728_v17 = vpop.permute.xlu1 %727 }
  0xfa   : > { %v738_v25 = vsel %vm731_vm10, %v726_v7, %v728_v17  ;;  %v739_v27 = vsel %vm731_vm10, %v728_v17, %v2327_v15 }
  0xfb   : > { %v754_v60 = vsel %vm2809_vm5, %v738_v25, 0.0  ;;  %v755_v28 = vsel %vm2815_vm6, %v739_v27, 0.0  ;;  %v3090_v27 = vld [vmem:[#allocation2 + $0x38] sm:$0x7f] }
  0xfc   : > { %1223 = vrot.lane.b32.xlu0 %v2937_v30, %s2500_s17  ;;  %2121 = vmatpush.msk.msra.mxu3 %vm330_vm2, %v755_v28 }
  0xfd   : > { %2116 = vmatpush.msk.msra.mxu2 %vm330_vm2, %v754_v60 }
  0xfe   : > { %v812_v29 = vpop.permute.xlu0 %811  ;;  %2122 = vmatpush.msk.msra.mxu3 %vm2815_vm6, %v737_v34 }
  0xff   : > { %1221 = vrot.lane.b32.xlu2 %v2921_v4, %s2500_s17  ;;  %2117 = vmatpush.msk.msra.mxu2 %vm2809_vm5, %v736_v33  ;;  %v834_v12 = vsel %vm833_vm11, %v2931_v13, %v812_v29  ;;  %v3101_v33 = vld [vmem:[#allocation2 + $0x10] sm:$0x7f] }
 0x100   : > { %2409 = vrot.lane.b32.xlu1 %v2890_v49, %s2501_s18  ;;  %2123 = vmatpush.msk.msra.mxu3 %vm2815_vm6, %v735_v35  ;;  %v3110_v40 = vpack.i.bf16 0.0, %v3101_v33 }
 0x101   : > { %v830_v24 = vpop.permute.xlu2 %829  ;;  %2118 = vmatpush.msk.msra.mxu2 %vm2809_vm5, %v734_v6  ;;  %v2330_v39 = vpop.permute.xlu1 %2329 }
 0x102   : > { %2124 = vmatpush.msk.msra.mxu3 %vm2815_vm6, %v733_v41  ;;  %v2332_v51 = vunpack.i.h.bf16 %v2330_v39  ;;  %v2331_v55 = vunpack.i.l.bf16 %v2330_v39 }
 0x103   : > { %2119 = vmatpush.msk.msra.mxu2 %vm2809_vm5, %v732_v38 }
 0x104   : > { %1339 = vrot.lane.b32.xlu0 %v2634_v20, %s2501_s18  ;;  %v835_v14 = vsel %vm833_vm11, %v812_v29, %v2331_v55 }
 0x106   : > { %v818_v42 = vpop.permute.xlu0 %817 }
 0x107   : > { %1337 = vrot.lane.b32.xlu2 %v2616_v18, %s2501_s18  ;;  %v837_v61 = vsel %vm833_vm11, %v818_v42, %v2332_v51  ;;  %v836_v57 = vsel %vm833_vm11, %v2957_v11, %v818_v42  ;;  %v2418_v11 = vpack.i.bf16 0.0, %v2881_v45  ;;  %v2110_v45 = vld [vmem:[%s3525_s1 + $0x10] sm:$0x7] }
 0x108   : > { %1355 = vrot.lane.b32.xlu1 %v2921_v4, %s2501_s18  ;;  %2112 = vmatmul.msk.f32.vlgmr.msra.gmra.mxu0 %vm326_vm9, %v2110_v45 }
 0x109   : > { %v3030_v37 = vpop.permute.xlu2 %2349  ;;  %v822_v26 = vpop.permute.xlu1 %821  ;;  %2114 = vmatmul.msk.f32.vlgmr.msra.gmra.mxu1 %vm326_vm9, %v2110_v45 }
 0x10a   : > { %v838_v5 = vsel %vm833_vm11, %v822_v26, %v2976_v1  ;;  %v2352_v17 = vunpack.i.h.bf16 %v3030_v37  ;;  %v2351_v2 = vunpack.i.l.bf16 %v3030_v37 }
 0x10c   : > { %1349 = vrot.lane.b32.xlu0 %v2638_v21, %s2501_s18  ;;  %v941_v42 = vsel %vm937_vm12, %v2351_v2, %v2352_v17  ;;  %v2115_v17 = vld [vmem:[%s3525_s1 + $0x14] sm:$0x7] }
 0x10d   : > { %2120 = vmatmul.msk.f32.vlgmr.msra.gmra.mxu2 %vm326_vm9, %v2115_v17  ;;  %2125 = vmatmul.msk.f32.vlgmr.msra.gmra.mxu3 %vm326_vm9, %v2115_v17 }
 0x10e   : > { %v2335_v44 = vpop.permute.xlu0 %2334 }
 0x10f   : > { %v2337_v47 = vunpack.i.h.bf16 %v2335_v44  ;;  %1357 = vrot.lane.b32.xlu2 %v2937_v30, %s2501_s18  ;;  %v2336_v48 = vunpack.i.l.bf16 %v2335_v44 }
 0x110   : > { %1351 = vrot.lane.b32.xlu1 %v2646_v22, %s2501_s18 }
 0x111   : > { %v841_v49 = vsel %vm833_vm11, %v830_v24, %v2337_v47  ;;  %v932_v50 = vpop.permute.xlu2 %931  ;;  %v839_v58 = vsel %vm833_vm11, %v2976_v1, %v2336_v48 }
 0x112   : > { %v857_v52 = vsel %vm2733_vm3, %v841_v49, 0.0  ;;  %v828_v54 = vpop.permute.xlu1 %827  ;;  %v3122_v49 = vld [vmem:[#allocation2 + $0x70] sm:$0x7f] }
 0x113   : > { %2132 = vmatpush.msk.msrb.mxu1 %vm330_vm2, %v857_v52  ;;  %v840_v43 = vsel %vm833_vm11, %v828_v54, %v830_v24  ;;  %v2126_v54 = vld [vmem:[%s3525_s1 + $0x18] sm:$0x7] }
 0x114   : > { %v856_v59 = vsel %vm2687_vm0, %v840_v43, 0.0  ;;  %1345 = vrot.lane.b32.xlu0 %v2652_v23, %s2501_s18 }
 0x115   : > { %2133 = vmatpush.msk.msrb.mxu1 %vm2733_vm3, %v839_v58  ;;  %2127 = vmatpush.msk.msrb.mxu0 %vm330_vm2, %v856_v59 }
 0x116   : > { %v2340_v62 = vpop.permute.xlu0 %2339 }
 0x117   : > { %2134 = vmatpush.msk.msrb.mxu1 %vm2733_vm3, %v837_v61  ;;  %1343 = vrot.lane.b32.xlu2 %v2626_v19, %s2501_s18  ;;  %v2342_v31 = vunpack.i.h.bf16 %v2340_v62  ;;  %v2341_v34 = vunpack.i.l.bf16 %v2340_v62 }
 0x118   : > { %2128 = vmatpush.msk.msrb.mxu0 %vm2687_vm0, %v838_v5  ;;  %2414 = vrot.lane.b32.xlu1 %v2498_v0, %s2501_s18 }
 0x119   : > { %2135 = vmatpush.msk.msrb.mxu1 %vm2733_vm3, %v835_v14  ;;  %v3068_v46 = vpop.permute.xlu2 %1003  ;;  %v938_v37 = vsel %vm937_vm12, %v2341_v34, %v2342_v31 }
 0x11a   : > { %2129 = vmatpush.msk.msrb.mxu0 %vm2687_vm0, %v836_v57  ;;  %v2345_v10 = vpop.permute.xlu1 %2344  ;;  %2136 = vmatmul.msk.f32.vlgmr.msrb.gmra.mxu1 %vm326_vm9, %v2126_v54 }
 0x11b   : > { %v2347_v60 = vunpack.i.h.bf16 %v2345_v10  ;;  %v2346_v6 = vunpack.i.l.bf16 %v2345_v10 }
 0x11c   : > { %2130 = vmatpush.msk.msrb.mxu0 %vm2687_vm0, %v834_v12  ;;  %1457 = vrot.lane.b32.xlu0 %v2937_v30, %s2502_s19 }
 0x11d   : > { %v940_v41 = vsel %vm937_vm12, %v2347_v60, %v2351_v2  ;;  %v939_v26 = vsel %vm937_vm12, %v2342_v31, %v2346_v6  ;;  %2131 = vmatmul.msk.f32.vlgmr.msrb.gmra.mxu0 %vm326_vm9, %v2126_v54 }
 0x11e   : > { %v2355_v8 = vpop.permute.xlu0 %2354 }
 0x11f   : > { %1455 = vrot.lane.b32.xlu2 %v2921_v4, %s2502_s19  ;;  %v2357_v13 = vunpack.i.h.bf16 %v2355_v8  ;;  %v2356_v15 = vunpack.i.l.bf16 %v2355_v8 }
 0x120   : > { %2419 = vrot.lane.b32.xlu1 %v2418_v11, %s2502_s19 }
 0x121   : > { %v3082_v9 = vpop.permute.xlu2 %1009  ;;  %v942_v35 = vsel %vm937_vm12, %v2356_v15, %v2357_v13 }
 0x122   : > { %v2360_v7 = vpop.permute.xlu1 %2359 }
 0x123   : > { %v2362_v1 = vunpack.i.h.bf16 %v2360_v7  ;;  %v2361_v16 = vunpack.i.l.bf16 %v2360_v7 }
 0x124   : > { %1451 = vrot.lane.b32.xlu0 %v2646_v22, %s2502_s19 }
 0x125   : > { %v943_v24 = vsel %vm937_vm12, %v2357_v13, %v2361_v16 }
 0x126   : > { %v934_v25 = vpop.permute.xlu0 %933 }
 0x127   : > { %v944_v28 = vsel %vm937_vm12, %v932_v50, %v934_v25  ;;  %v945_v29 = vsel %vm937_vm12, %v934_v25, %v2362_v1  ;;  %1449 = vrot.lane.b32.xlu2 %v2638_v21, %s2502_s19 }
 0x128   : > { %2138 = vmatpush.msk.msrb.mxu2 %vm330_vm2, %v944_v28  ;;  %2140 = vmatpush.msk.msrb.mxu3 %vm330_vm2, %v945_v29 }
 0x129   : > { %1729 = vrot.lane.b32.xlu1 %v3090_v27, %s2504_s21  ;;  %v2370_v38 = vpop.permute.xlu2 %2369 }
 0x12a   : > { %972 = vmatpush.msrb.mxu2 %v942_v35  ;;  %992 = vmatpush.msrb.mxu3 %v943_v24  ;;  %v1002_v39 = vpop.permute.xlu1 %1001  ;;  %v2372_v43 = vunpack.i.h.bf16 %v2370_v38  ;;  %v2371_v58 = vunpack.i.l.bf16 %v2370_v38 }
 0x12b   : > { %v1026_v15 = vsel %vm1025_vm13, %v1002_v39, %v3068_v46  ;;  %v2137_v39 = vld [vmem:[%s3525_s1 + $0x1c] sm:$0x7] }
 0x12c   : > { %973 = vmatpush.msrb.mxu2 %v940_v41  ;;  %993 = vmatpush.msrb.mxu3 %v941_v42 }
 0x12d   : > { %1443 = vrot.lane.b32.xlu0 %v2626_v19, %s2502_s19 }
 0x12e   : > { %v2365_v44 = vpop.permute.xlu0 %2364  ;;  %974 = vmatpush.msrb.mxu2 %v938_v37  ;;  %994 = vmatpush.msrb.mxu3 %v939_v26 }
 0x12f   : > { %2424 = vrot.lane.b32.xlu2 %v3110_v40, %s2504_s21  ;;  %v2367_v5 = vunpack.i.h.bf16 %v2365_v44  ;;  %v2366_v10 = vunpack.i.l.bf16 %v2365_v44  ;;  %2139 = vmatmul.msk.f32.vlgmr.msrb.gmra.mxu2 %vm326_vm9, %v2137_v39 }
 0x130   : > { %2141 = vmatmul.msk.f32.vlgmr.msrb.gmra.mxu3 %vm326_vm9, %v2137_v39  ;;  %v2486_v39 = vld [vmem:[#allocation2 + $0x58] sm:$0xff] }
 0x131   : > { %1445 = vrot.lane.b32.xlu1 %v2652_v23, %s2502_s19  ;;  %v3120_v47 = vpop.permute.xlu2 %2374  ;;  %v1029_v1 = vsel %vm1025_vm13, %v3082_v9, %v2367_v5  ;;  %v1027_v45 = vsel %vm1025_vm13, %v3068_v46, %v2366_v10 }
 0x132   : > { %v1008_v48 = vpop.permute.xlu1 %1007  ;;  %v2377_v35 = vunpack.i.h.bf16 %v3120_v47  ;;  %v2376_v42 = vunpack.i.l.bf16 %v3120_v47 }
 0x133   : > { %v1028_v7 = vsel %vm1025_vm13, %v1008_v48, %v3082_v9 }
 0x135   : > { %1437 = vrot.lane.b32.xlu0 %v2616_v18, %s2502_s19 }
 0x136   : > { %v1014_v50 = vpop.permute.xlu0 %1013 }
 0x137   : > { %1727 = vrot.lane.b32.xlu2 %v3122_v49, %s2504_s21 }
 0x139   : > { %1439 = vrot.lane.b32.xlu1 %v2634_v20, %s2502_s19  ;;  %v3130_v51 = vpop.permute.xlu2 %1159 }
 0x13a   : > { %v1016_v52 = vpop.permute.xlu1 %1015 }
 0x13b   : > { %v1030_v11 = vsel %vm1025_vm13, %v1014_v50, %v1016_v52  ;;  %v1031_v8 = vsel %vm1025_vm13, %v1016_v52, %v2371_v58 }
 0x13d   : > { %1723 = vrot.lane.b32.xlu0 %v2646_v22, %s2504_s21 }
 0x13e   : > { %v1020_v55 = vpop.permute.xlu0 %1019 }
 0x13f   : > { %2429 = vrot.lane.b32.xlu2 %v2498_v0, %s2502_s19 }
 0x141   : > { %1629 = vrot.lane.b32.xlu1 %v3090_v27, %s2503_s20  ;;  %v1166_v18 = vpop.permute.xlu2 %1165 }
 0x142   : > { %v1022_v59 = vpop.permute.xlu1 %1021 }
 0x143   : > { %v1032_v61 = vsel %vm1025_vm13, %v1020_v55, %v1022_v59  ;;  %v1033_v62 = vsel %vm1025_vm13, %v1022_v59, %v2372_v43 }
 0x144   : > { %v1048_v14 = vsel %vm2809_vm5, %v1032_v61, 0.0  ;;  %v1049_v57 = vsel %vm2815_vm6, %v1033_v62, 0.0 }
 0x145   : > { %1717 = vrot.lane.b32.xlu0 %v2652_v23, %s2504_s21  ;;  %2143 = vmatpush.msk.msra.mxu0 %vm330_vm2, %v1048_v14 }
 0x146   : > { %2148 = vmatpush.msk.msra.mxu1 %vm330_vm2, %v1049_v57  ;;  %v1154_v12 = vpop.permute.xlu0 %1153 }
 0x147   : > { %2434 = vrot.lane.b32.xlu2 %v3110_v40, %s2503_s20  ;;  %2144 = vmatpush.msk.msra.mxu0 %vm2809_vm5, %v1030_v11  ;;  %v1175_v48 = vsel %vm259_vm1, %v2376_v42, %v1154_v12 }
 0x148   : > { %2149 = vmatpush.msk.msra.mxu1 %vm2815_vm6, %v1031_v8 }
 0x149   : > { %2439 = vrot.lane.b32.xlu1 %v2498_v0, %s2504_s21  ;;  %v1174_v13 = vpop.permute.xlu2 %1173  ;;  %2145 = vmatpush.msk.msra.mxu0 %vm2809_vm5, %v1028_v7 }
 0x14a   : > { %2150 = vmatpush.msk.msra.mxu1 %vm2815_vm6, %v1029_v1  ;;  %v1156_v16 = vpop.permute.xlu1 %1155  ;;  %v2142_v1 = vld [vmem:[%s3525_s1 + $0x20] sm:$0x7] }
 0x14b   : > { %2146 = vmatpush.msk.msra.mxu0 %vm2809_vm5, %v1026_v15  ;;  %v1176_v50 = vsel %vm259_vm1, %v1154_v12, %v1156_v16 }
 0x14c   : > { %2151 = vmatpush.msk.msra.mxu1 %vm2815_vm6, %v1027_v45  ;;  %2147 = vmatmul.msk.f32.vlgmr.msra.gmra.mxu0 %vm326_vm9, %v2142_v1 }
 0x14d   : > { %1627 = vrot.lane.b32.xlu0 %v3122_v49, %s2503_s20  ;;  %2152 = vmatmul.msk.f32.vlgmr.msra.gmra.mxu1 %vm326_vm9, %v2142_v1 }
 0x14e   : > { %v1162_v9 = vpop.permute.xlu0 %1161 }
 0x14f   : > { %1721 = vrot.lane.b32.xlu2 %v2638_v21, %s2504_s21  ;;  %v1178_v44 = vsel %vm259_vm1, %v3130_v51, %v1162_v9  ;;  %v2483_v9 = vld [vmem:[#allocation2 + $0x68] sm:$0xff] }
 0x150   : > { %v2453_v17 = vpack.i.bf16 %v2483_v9, %v3101_v33 }
 0x151   : > { %1623 = vrot.lane.b32.xlu1 %v2646_v22, %s2503_s20  ;;  %v3190_v46 = vpop.permute.xlu2 %2394 }
 0x152   : > { %v2380_v25 = vpop.permute.xlu1 %2379  ;;  %v2396_v61 = vunpack.i.l.bf16 %v3190_v46 }
 0x153   : > { %v2382_v28 = vunpack.i.h.bf16 %v2380_v25  ;;  %v2381_v29 = vunpack.i.l.bf16 %v2380_v25 }
 0x155   : > { %1715 = vrot.lane.b32.xlu0 %v2626_v19, %s2504_s21  ;;  %v1179_v26 = vsel %vm259_vm1, %v2381_v29, %v1166_v18 }
 0x156   : > { %v1168_v2 = vpop.permute.xlu0 %1167 }
 0x157   : > { %1711 = vrot.lane.b32.xlu2 %v2634_v20, %s2504_s21  ;;  %v1180_v37 = vsel %vm259_vm1, %v1166_v18, %v1168_v2  ;;  %v2161_v2 = vld [vmem:[%s3525_s1 + $0x4] sm:$0x7] }
 0x159   : > { %1917 = vrot.lane.b32.xlu1 %v3090_v27, %s2506_s23  ;;  %v1222_v60 = vpop.permute.xlu2 %1221 }
 0x15a   : > { %v1172_v31 = vpop.permute.xlu1 %1171 }
 0x15b   : > { %v1181_v34 = vsel %vm259_vm1, %v2382_v28, %v1172_v31  ;;  %v1182_v6 = vsel %vm259_vm1, %v1172_v31, %v1174_v13 }
 0x15c   : > { %v1197_v24 = vsel %vm2687_vm0, %v1181_v34, 0.0  ;;  %v1198_v38 = vsel %vm2733_vm3, %v1182_v6, 0.0  ;;  %v2484_v6 = vld [vmem:[#allocation2 + $0x78] sm:$0xff] }
 0x15d   : > { %1617 = vrot.lane.b32.xlu0 %v2652_v23, %s2503_s20  ;;  %2166 = vmatpush.msk.msrb.mxu0 %vm330_vm2, %v1197_v24  ;;  %v1177_v23 = vsel %vm259_vm1, %v2377_v35, %v3130_v51  ;;  %v2485_v35 = vld [vmem:[#allocation2 + $0x48] sm:$0xff] }
 0x15e   : > { %2171 = vmatpush.msk.msrb.mxu1 %vm330_vm2, %v1198_v38  ;;  %v3212_v41 = vpop.permute.xlu0 %2384 }
 0x15f   : > { %2444 = vrot.lane.b32.xlu2 %v3110_v40, %s2506_s23  ;;  %2167 = vmatpush.msk.msrb.mxu0 %vm2687_vm0, %v1179_v26  ;;  %v3237_v40 = vld [vmem:[#allocation2 + $0x8] sm:$0xff]  ;;  %v2387_v12 = vunpack.i.h.bf16 %v3212_v41  ;;  %v2386_v10 = vunpack.i.l.bf16 %v3212_v41  ;;  %v2463_v41 = vpack.i.bf16 %v2484_v6, %v2486_v39  ;;  %v2487_v26 = vld [vmem:[#allocation2 + $0x18] sm:$0xff] }
 0x160   : > { %2172 = vmatpush.msk.msrb.mxu1 %vm2733_vm3, %v1180_v37 }
 0x161   : > { %2449 = vrot.lane.b32.xlu1 %v2498_v0, %s2503_s20  ;;  %v3230_v47 = vpop.permute.xlu2 %1337  ;;  %2168 = vmatpush.msk.msrb.mxu0 %vm2687_vm0, %v1177_v23 }
 0x162   : > { %2173 = vmatpush.msk.msrb.mxu1 %vm2733_vm3, %v1178_v44  ;;  %v2390_v51 = vpop.permute.xlu1 %2389  ;;  %v2176_v44 = vld [vmem:[%s3525_s1 + $0x8] sm:$0x7] }
 0x163   : > { %2169 = vmatpush.msk.msrb.mxu0 %vm2687_vm0, %v1175_v48  ;;  %v2392_v62 = vunpack.i.h.bf16 %v2390_v51  ;;  %v2391_v11 = vunpack.i.l.bf16 %v2390_v51 }
 0x164   : > { %2174 = vmatpush.msk.msrb.mxu1 %vm2733_vm3, %v1176_v50 }
 0x165   : > { %1709 = vrot.lane.b32.xlu0 %v3237_v40, %s2504_s21  ;;  %v1227_v13 = vsel %vm311_vm4, %v2392_v62, %v2396_v61  ;;  %v1226_v45 = vsel %vm311_vm4, %v2387_v12, %v2391_v11 }
 0x166   : > { %v2400_v52 = vpop.permute.xlu0 %2399 }
 0x167   : > { %1621 = vrot.lane.b32.xlu2 %v2638_v21, %s2503_s20  ;;  %v2402_v18 = vunpack.i.h.bf16 %v2400_v52  ;;  %v2401_v43 = vunpack.i.l.bf16 %v2400_v52  ;;  %v2397_v21 = vunpack.i.h.bf16 %v3190_v46 }
 0x169   : > { %1915 = vrot.lane.b32.xlu1 %v3122_v49, %s2506_s23  ;;  %v1358_v54 = vpop.permute.xlu2 %1357  ;;  %v1228_v16 = vsel %vm311_vm4, %v2396_v61, %v2397_v21 }
 0x16a   : > { %v2405_v55 = vpop.permute.xlu1 %2404 }
 0x16b   : > { %v2407_v58 = vunpack.i.h.bf16 %v2405_v55  ;;  %v2406_v59 = vunpack.i.l.bf16 %v2405_v55 }
 0x16d   : > { %1615 = vrot.lane.b32.xlu0 %v2626_v19, %s2503_s20  ;;  %v1231_v14 = vsel %vm311_vm4, %v2407_v58, %v1222_v60  ;;  %v1229_v19 = vsel %vm311_vm4, %v2401_v43, %v2402_v18  ;;  %v1230_v8 = vsel %vm311_vm4, %v2402_v18, %v2406_v59  ;;  %v2488_v18 = vld [vmem:[#allocation2 + $0x40] sm:$0xff] }
 0x16e   : > { %v1224_v5 = vpop.permute.xlu0 %1223  ;;  %2162 = vmatpush.msk.msra.mxu2 %vm330_vm2, %v1231_v14  ;;  %v2478_v59 = vpack.i.bf16 %v3237_v40, %v2488_v18 }
 0x16f   : > { %v1232_v57 = vsel %vm311_vm4, %v1222_v60, %v1224_v5  ;;  %1611 = vrot.lane.b32.xlu2 %v2634_v20, %s2503_s20  ;;  %v2489_v20 = vld [vmem:[#allocation2 + $0x8] sm:$0xff] }
 0x170   : > { %2164 = vmatpush.msk.msra.mxu3 %vm330_vm2, %v1232_v57  ;;  %1259 = vmatpush.msra.mxu2 %v1229_v19 }
 0x171   : > { %1911 = vrot.lane.b32.xlu1 %v2646_v22, %s2506_s23  ;;  %v3267_v7 = vpop.permute.xlu2 %1343  ;;  %v1225_v22 = vsel %vm311_vm4, %v2386_v10, %v2387_v12  ;;  %v1199_v12 = vld [vmem:[%s3525_s1] sm:$0x7] }
 0x172   : > { %1279 = vmatpush.msra.mxu3 %v1230_v8  ;;  %v3274_v15 = vpop.permute.xlu1 %2409  ;;  %1260 = vmatpush.msra.mxu2 %v1227_v13 }
 0x173   : > { %v2411_v52 = vunpack.i.l.bf16 %v3274_v15  ;;  %2170 = vmatmul.msk.f32.vlgmr.msrb.gmra.mxu0 %vm326_vm9, %v1199_v12  ;;  %2175 = vmatmul.msk.f32.vlgmr.msrb.gmra.mxu1 %vm326_vm9, %v1199_v12 }
 0x174   : > { %1280 = vmatpush.msra.mxu3 %v1228_v16  ;;  %1261 = vmatpush.msra.mxu2 %v1225_v22 }
 0x175   : > { %1830 = vrot.lane.b32.xlu0 %v3090_v27, %s2505_s22  ;;  %v2412_v27 = vunpack.i.h.bf16 %v3274_v15  ;;  %2163 = vmatmul.msk.f32.vlgmr.msra.gmra.mxu2 %vm326_vm9, %v2161_v2  ;;  %v1359_v61 = vsel %vm452_vm7, %v2411_v52, %v3230_v47 }
 0x176   : > { %1281 = vmatpush.msra.mxu3 %v1226_v45  ;;  %v1340_v46 = vpop.permute.xlu0 %1339 }
 0x177   : > { %1609 = vrot.lane.b32.xlu2 %v3237_v40, %s2503_s20  ;;  %2165 = vmatmul.msk.f32.vlgmr.msra.gmra.mxu3 %vm326_vm9, %v2161_v2 }
 0x179   : > { %2454 = vrot.lane.b32.xlu1 %v2453_v17, %s2505_s22  ;;  %v3286_v25 = vpop.permute.xlu2 %1455 }
 0x17a   : > { %v1356_v33 = vpop.permute.xlu1 %1355 }
 0x17b   : > { %v1365_v60 = vsel %vm452_vm7, %v2412_v27, %v1356_v33  ;;  %v1366_v28 = vsel %vm452_vm7, %v1356_v33, %v1358_v54 }
 0x17c   : > { %v1381_v29 = vsel %vm2809_vm5, %v1365_v60, 0.0  ;;  %v1382_v31 = vsel %vm2815_vm6, %v1366_v28, 0.0 }
 0x17d   : > { %2459 = vrot.lane.b32.xlu0 %v2498_v0, %s2506_s23  ;;  %2177 = vmatpush.msk.msrb.mxu2 %vm330_vm2, %v1381_v29  ;;  %v2198_v29 = vld [vmem:[%s3525_s1 + $0x10] sm:$0x7] }
 0x17e   : > { %2182 = vmatpush.msk.msrb.mxu3 %vm330_vm2, %v1382_v31  ;;  %v1350_v34 = vpop.permute.xlu0 %1349 }
 0x17f   : > { %1905 = vrot.lane.b32.xlu2 %v2484_v6, %s2506_s23 }
 0x181   : > { %1909 = vrot.lane.b32.xlu1 %v2485_v35, %s2506_s23  ;;  %v1450_v24 = vpop.permute.xlu2 %1449 }
 0x182   : > { %v1352_v38 = vpop.permute.xlu1 %1351 }
 0x183   : > { %v1364_v42 = vsel %vm452_vm7, %v1350_v34, %v1352_v38 }
 0x184   : > { %2183 = vmatpush.msk.msrb.mxu3 %vm2815_vm6, %v1364_v42 }
 0x185   : > { %1828 = vrot.lane.b32.xlu0 %v3122_v49, %s2505_s22  ;;  %v1360_v49 = vsel %vm452_vm7, %v3230_v47, %v1340_v46 }
 0x186   : > { %v1346_v0 = vpop.permute.xlu0 %1345 }
 0x187   : > { %2464 = vrot.lane.b32.xlu2 %v2463_v41, %s2505_s22  ;;  %v1362_v37 = vsel %vm452_vm7, %v3267_v7, %v1346_v0 }
 0x188   : > { %2184 = vmatpush.msk.msrb.mxu3 %vm2815_vm6, %v1362_v37 }
 0x189   : > { %1899 = vrot.lane.b32.xlu1 %v2487_v26, %s2506_s23  ;;  %v3317_v23 = vpop.permute.xlu2 %2424 }
 0x18a   : > { %2185 = vmatpush.msk.msrb.mxu3 %vm2815_vm6, %v1360_v49  ;;  %v2415_v48 = vpop.permute.xlu1 %2414  ;;  %v2426_v57 = vunpack.i.l.bf16 %v3317_v23  ;;  %v2427_v60 = vunpack.i.h.bf16 %v3317_v23 }
 0x18b   : > { %v2417_v50 = vunpack.i.h.bf16 %v2415_v48  ;;  %v2416_v51 = vunpack.i.l.bf16 %v2415_v48  ;;  %2186 = vmatmul.msk.f32.vlgmr.msrb.gmra.mxu3 %vm326_vm9, %v2176_v44 }
 0x18c   : > { %2201 = vmatpush.msk.msra.mxu3 %vm330_vm2, %v2937_v30 }
 0x18d   : > { %2469 = vrot.lane.b32.xlu0 %v2951_v53, %s2505_s22  ;;  %v1363_v54 = vsel %vm452_vm7, %v2416_v51, %v1350_v34  ;;  %v1361_v53 = vsel %vm452_vm7, %v2417_v50, %v3267_v7 }
 0x18e   : > { %1576 = vmatpush.msra.mxu3 %v2483_v9  ;;  %v1458_v55 = vpop.permute.xlu0 %1457  ;;  %2178 = vmatpush.msk.msrb.mxu2 %vm2809_vm5, %v1363_v54 }
 0x18f   : > { %1903 = vrot.lane.b32.xlu2 %v2488_v18, %s2506_s23  ;;  %v1466_v30 = vsel %vm554_vm8, %v3286_v25, %v1458_v55 }
 0x190   : > { %1577 = vmatpush.msra.mxu3 %v2484_v6  ;;  %v1482_v43 = vsel %vm2733_vm3, %v1466_v30, 0.0  ;;  %2179 = vmatpush.msk.msrb.mxu2 %vm2809_vm5, %v1361_v53 }
 0x191   : > { %1897 = vrot.lane.b32.xlu1 %v3237_v40, %s2506_s23  ;;  %v1728_v58 = vpop.permute.xlu2 %1727  ;;  %2193 = vmatpush.msk.msra.mxu1 %vm330_vm2, %v1482_v43 }
 0x192   : > { %1578 = vmatpush.msra.mxu3 %v2487_v26  ;;  %v2420_v62 = vpop.permute.xlu1 %2419  ;;  %2180 = vmatpush.msk.msrb.mxu2 %vm2809_vm5, %v1359_v61  ;;  %v2187_v61 = vld [vmem:[%s3525_s1 + $0xc] sm:$0x7] }
 0x193   : > { %v2421_v5 = vunpack.i.l.bf16 %v2420_v62  ;;  %v2422_v14 = vunpack.i.h.bf16 %v2420_v62  ;;  %2181 = vmatmul.msk.f32.vlgmr.msrb.gmra.mxu2 %vm326_vm9, %v2176_v44  ;;  %2202 = vmatmul.msk.f32.vlgmr.msra.gmra.mxu3 %vm326_vm9, %v2198_v29 }
 0x194   : > { %2199 = vmatpush.msk.msra.mxu2 %vm330_vm2, %v2921_v4 }
 0x195   : > { %2479 = vrot.lane.b32.xlu0 %v2478_v59, %s2505_s22  ;;  %v1465_v40 = vsel %vm554_vm8, %v2421_v5, %v3286_v25  ;;  %v1463_v10 = vsel %vm554_vm8, %v2422_v14, %v1450_v24  ;;  %v2214_v14 = vld [vmem:[%s3525_s1 + $0x18] sm:$0x7] }
 0x196   : > { %1556 = vmatpush.msra.mxu2 %v2485_v35  ;;  %v1452_v21 = vpop.permute.xlu0 %1451  ;;  %v1481_v47 = vsel %vm2687_vm0, %v1465_v40, 0.0 }
 0x197   : > { %2474 = vrot.lane.b32.xlu2 %v2388_v32, %s2505_s22  ;;  %v1464_v4 = vsel %vm554_vm8, %v1450_v24, %v1452_v21  ;;  %2188 = vmatpush.msk.msra.mxu0 %vm330_vm2, %v1481_v47 }
 0x198   : > { %1557 = vmatpush.msra.mxu2 %v2488_v18  ;;  %2194 = vmatpush.msk.msra.mxu1 %vm2733_vm3, %v1464_v4 }
 0x199   : > { %v2430_v19 = vpop.permute.xlu2 %2429  ;;  %2189 = vmatpush.msk.msra.mxu0 %vm2687_vm0, %v1463_v10 }
 0x19a   : > { %1558 = vmatpush.msra.mxu2 %v2489_v20  ;;  %v2431_v7 = vunpack.i.l.bf16 %v2430_v19  ;;  %v2432_v9 = vunpack.i.h.bf16 %v2430_v19  ;;  %v2203_v19 = vld [vmem:[%s3525_s1 + $0x14] sm:$0x7] }
 0x19b   : > { %v1730_v32 = vpop.permute.xlu1 %1729  ;;  %2200 = vmatmul.msk.f32.vlgmr.msra.gmra.mxu2 %vm326_vm9, %v2198_v29 }
 0x19c   : > { %v1739_v11 = vsel %vm833_vm11, %v1728_v58, %v1730_v32  ;;  %v1740_v8 = vsel %vm833_vm11, %v1730_v32, %v2426_v57 }
 0x19d   : > { %v1755_v1 = vsel %vm2687_vm0, %v1739_v11, 0.0  ;;  %v1756_v13 = vsel %vm2733_vm3, %v1740_v8, 0.0 }
 0x19e   : > { %2215 = vmatpush.msk.msrb.mxu2 %vm330_vm2, %v1755_v1  ;;  %2220 = vmatpush.msk.msrb.mxu3 %vm330_vm2, %v1756_v13 }
 0x19f   : > { %v1444_v15 = vpop.permute.xlu0 %1443 }
 0x1a0   : > { %v1461_v16 = vsel %vm554_vm8, %v2431_v7, %v1444_v15 }
 0x1a1   : > { %2190 = vmatpush.msk.msra.mxu0 %vm2687_vm0, %v1461_v16  ;;  %v2435_v22 = vpop.permute.xlu2 %2434 }
 0x1a2   : > { %v2436_v31 = vunpack.i.l.bf16 %v2435_v22  ;;  %v2437_v52 = vunpack.i.h.bf16 %v2435_v22 }
 0x1a3   : > { %v1446_v45 = vpop.permute.xlu1 %1445 }
 0x1a4   : > { %v1462_v17 = vsel %vm554_vm8, %v1444_v15, %v1446_v45 }
 0x1a5   : > { %2195 = vmatpush.msk.msra.mxu1 %vm2733_vm3, %v1462_v17 }
 0x1a7   : > { %v1438_v46 = vpop.permute.xlu0 %1437 }
 0x1a8   : > { %v1459_v25 = vsel %vm554_vm8, %v2432_v9, %v1438_v46 }
 0x1a9   : > { %2191 = vmatpush.msk.msra.mxu0 %vm2687_vm0, %v1459_v25  ;;  %v1722_v2 = vpop.permute.xlu2 %1721 }
 0x1aa   : > { %2192 = vmatmul.msk.f32.vlgmr.msra.gmra.mxu0 %vm326_vm9, %v2187_v61 }
 0x1ab   : > { %v1440_v27 = vpop.permute.xlu1 %1439 }
 0x1ac   : > { %v1460_v33 = vsel %vm554_vm8, %v1438_v46, %v1440_v27 }
 0x1ad   : > { %2196 = vmatpush.msk.msra.mxu1 %vm2733_vm3, %v1460_v33 }
 0x1ae   : > { %2197 = vmatmul.msk.f32.vlgmr.msra.gmra.mxu1 %vm326_vm9, %v2187_v61 }
 0x1af   : > { %v1724_v28 = vpop.permute.xlu0 %1723 }
 0x1b0   : > { %v1737_v34 = vsel %vm833_vm11, %v1722_v2, %v1724_v28  ;;  %v1738_v6 = vsel %vm833_vm11, %v1724_v28, %v2427_v60  ;;  %v372_v60 = vpop.f32.mrf.mxu1  ;;  %v352_v28 = vpop.f32.mrf.mxu0 }
 0x1b1   : > { %2216 = vmatpush.msk.msrb.mxu2 %vm2687_vm0, %v1737_v34  ;;  %2221 = vmatpush.msk.msrb.mxu3 %vm2733_vm3, %v1738_v6  ;;  %v1712_v35 = vpop.permute.xlu2 %1711  ;;  %v401_v6 = vpop.f32.mrf.mxu2 }
 0x1b3   : > { %v1630_v24 = vpop.permute.xlu1 %1629 }
 0x1b4   : > { %v1640_v38 = vsel %vm731_vm10, %v1630_v24, %v2436_v31  ;;  %v421_v31 = vpop.f32.mrf.mxu3 }
 0x1b5   : > { %v1656_v39 = vsel %vm2815_vm6, %v1640_v38, 0.0 }
 0x1b6   : > { %2209 = vmatpush.msk.msrb.mxu1 %vm330_vm2, %v1656_v39  ;;  %v422_v39 = vadd.f32 %v421_v31, %v372_v60 }
 0x1b7   : > { %v1718_v41 = vpop.permute.xlu0 %1717 }
 0x1b9   : > { %v2445_v42 = vpop.permute.xlu2 %2444 }
 0x1ba   : > { %v2446_v53 = vunpack.i.l.bf16 %v2445_v42  ;;  %v2447_v13 = vunpack.i.h.bf16 %v2445_v42 }
 0x1bb   : > { %v2440_v0 = vpop.permute.xlu1 %2439 }
 0x1bc   : > { %v2442_v37 = vunpack.i.h.bf16 %v2440_v0  ;;  %v2441_v26 = vunpack.i.l.bf16 %v2440_v0 }
 0x1be   : > { %v1736_v23 = vsel %vm833_vm11, %v1718_v41, %v2441_v26  ;;  %v1734_v49 = vsel %vm833_vm11, %v1712_v35, %v2442_v37  ;;  %v525_v37 = vpop.f32.mrf.mxu1  ;;  %v505_v26 = vpop.f32.mrf.mxu0 }
 0x1bf   : > { %v1628_v44 = vpop.permute.xlu0 %1627  ;;  %2222 = vmatpush.msk.msrb.mxu3 %vm2733_vm3, %v1736_v23 }
 0x1c0   : > { %v1639_v48 = vsel %vm731_vm10, %v1628_v44, %v1630_v24 }
 0x1c1   : > { %v1655_v50 = vsel %vm2809_vm5, %v1639_v48, 0.0  ;;  %2223 = vmatpush.msk.msrb.mxu3 %vm2733_vm3, %v1734_v49  ;;  %v1622_v51 = vpop.permute.xlu2 %1621  ;;  %v529_v49 = vadd.f32 %v525_v37, %v422_v39  ;;  %v627_v48 = vpop.f32.mrf.mxu3 }
 0x1c2   : > { %2204 = vmatpush.msk.msrb.mxu0 %vm330_vm2, %v1655_v50  ;;  %2224 = vmatmul.msk.f32.vlgmr.msrb.gmra.mxu3 %vm326_vm9, %v2214_v14 }
 0x1c3   : > { %v1624_v54 = vpop.permute.xlu1 %1623 }
 0x1c4   : > { %v1638_v55 = vsel %vm731_vm10, %v1624_v54, %v2437_v52  ;;  %v1637_v18 = vsel %vm731_vm10, %v1622_v51, %v1624_v54  ;;  %v607_v51 = vpop.f32.mrf.mxu2 }
 0x1c5   : > { %2210 = vmatpush.msk.msrb.mxu1 %vm2815_vm6, %v1638_v55  ;;  %2205 = vmatpush.msk.msrb.mxu0 %vm2809_vm5, %v1637_v18  ;;  %v2230_v18 = vld [vmem:[%s3525_s1 + $0x20] sm:$0x7] }
 0x1c6   : > { %v658_v61 = vpop.f32.mrf.mxu0 }
 0x1c7   : > { %v1716_v30 = vpop.permute.xlu0 %1715 }
 0x1c8   : > { %v1735_v56 = vsel %vm833_vm11, %v1716_v30, %v1718_v41  ;;  %v402_v41 = vadd.f32 %v401_v6, %v352_v28  ;;  %v631_v30 = vadd.f32 %v627_v48, %v529_v49 }
 0x1c9   : > { %2217 = vmatpush.msk.msrb.mxu2 %vm2687_vm0, %v1735_v56  ;;  %v1612_v58 = vpop.permute.xlu2 %1611 }
 0x1ca   : > { %v528_v44 = vadd.f32 %v505_v26, %v402_v41 }
 0x1cb   : > { %v1918_v43 = vpop.permute.xlu1 %1917 }
 0x1cc   : > { %v1928_v59 = vsel %vm1025_vm13, %v1918_v43, %v2446_v53  ;;  %v630_v53 = vadd.f32 %v607_v51, %v528_v44 }
 0x1cd   : > { %v1944_v62 = vsel %vm2815_vm6, %v1928_v59, 0.0  ;;  %v678_v59 = vpop.f32.mrf.mxu1 }
 0x1ce   : > { %2236 = vmatpush.msk.msra.mxu3 %vm330_vm2, %v1944_v62 }
 0x1cf   : > { %v1618_v5 = vpop.permute.xlu0 %1617 }
 0x1d1   : > { %v1610_v57 = vpop.permute.xlu2 %1609 }
 0x1d2   : > { %v1633_v15 = vsel %vm731_vm10, %v1610_v57, %v1612_v58 }
 0x1d3   : > { %v2450_v40 = vpop.permute.xlu1 %2449 }
 0x1d4   : > { %v2452_v21 = vunpack.i.h.bf16 %v2450_v40  ;;  %v2451_v47 = vunpack.i.l.bf16 %v2450_v40  ;;  %v804_v40 = vpop.f32.mrf.mxu3 }
 0x1d6   : > { %v1636_v4 = vsel %vm731_vm10, %v1618_v5, %v2451_v47  ;;  %v1634_v12 = vsel %vm731_vm10, %v1612_v58, %v2452_v21 }
 0x1d7   : > { %v1710_v10 = vpop.permute.xlu0 %1709  ;;  %2211 = vmatpush.msk.msrb.mxu1 %vm2815_vm6, %v1636_v4  ;;  %v784_v4 = vpop.f32.mrf.mxu2 }
 0x1d8   : > { %v1733_v20 = vsel %vm833_vm11, %v1710_v10, %v1712_v35 }
 0x1d9   : > { %2218 = vmatpush.msk.msrb.mxu2 %vm2687_vm0, %v1733_v20  ;;  %2212 = vmatpush.msk.msrb.mxu1 %vm2815_vm6, %v1634_v12  ;;  %v1906_v7 = vpop.permute.xlu2 %1905  ;;  %v2225_v20 = vld [vmem:[%s3525_s1 + $0x1c] sm:$0x7] }
 0x1da   : > { %2219 = vmatmul.msk.f32.vlgmr.msrb.gmra.mxu2 %vm326_vm9, %v2214_v14  ;;  %2213 = vmatmul.msk.f32.vlgmr.msrb.gmra.mxu1 %vm326_vm9, %v2203_v19  ;;  %v681_v14 = vadd.f32 %v658_v61, %v630_v53 }
 0x1db   : > { %v1916_v32 = vpop.permute.xlu1 %1915 }
 0x1dc   : > { %v1927_v11 = vsel %vm1025_vm13, %v1916_v32, %v1918_v43 }
 0x1dd   : > { %v1943_v8 = vsel %vm2809_vm5, %v1927_v11, 0.0  ;;  %v807_v11 = vadd.f32 %v784_v4, %v681_v14 }
 0x1de   : > { %2231 = vmatpush.msk.msra.mxu2 %vm330_vm2, %v1943_v8 }
 0x1df   : > { %v1616_v1 = vpop.permute.xlu0 %1615 }
 0x1e0   : > { %v1635_v36 = vsel %vm731_vm10, %v1616_v1, %v1618_v5  ;;  %v682_v5 = vadd.f32 %v678_v59, %v631_v30  ;;  %v886_v1 = vpop.f32.mrf.mxu0 }
 0x1e1   : > { %2206 = vmatpush.msk.msrb.mxu0 %vm2809_vm5, %v1635_v36  ;;  %v3472_v9 = vpop.permute.xlu2 %2464 }
 0x1e2   : > { %v2466_v17 = vunpack.i.l.bf16 %v3472_v9  ;;  %v2467_v21 = vunpack.i.h.bf16 %v3472_v9  ;;  %v808_v32 = vadd.f32 %v804_v40, %v682_v5  ;;  %v976_v9 = vpop.f32.mrf.mxu2 }
 0x1e3   : > { %2207 = vmatpush.msk.msrb.mxu0 %vm2809_vm5, %v1633_v15  ;;  %v1912_v16 = vpop.permute.xlu1 %1911  ;;  %v909_v15 = vadd.f32 %v886_v1, %v807_v11 }
 0x1e4   : > { %v1926_v22 = vsel %vm1025_vm13, %v1912_v16, %v2447_v13  ;;  %2208 = vmatmul.msk.f32.vlgmr.msrb.gmra.mxu0 %vm326_vm9, %v2203_v19 }
 0x1e5   : > { %2237 = vmatpush.msk.msra.mxu3 %vm2815_vm6, %v1926_v22  ;;  %v999_v63 = vadd.f32 %v976_v9, %v909_v15 }
 0x1e7   : > { %v1831_v45 = vpop.permute.xlu0 %1830 }
 0x1e9   : > { %v1904_v24 = vpop.permute.xlu2 %1903 }
 0x1ea   : > { %v1923_v0 = vsel %vm1025_vm13, %v1904_v24, %v1906_v7 }
 0x1eb   : > { %v2455_v46 = vpop.permute.xlu1 %2454 }
 0x1ec   : > { %v2457_v25 = vunpack.i.h.bf16 %v2455_v46  ;;  %v2456_v2 = vunpack.i.l.bf16 %v2455_v46 }
 0x1ee   : > { %v1841_v27 = vsel %vm937_vm12, %v1831_v45, %v2456_v2  ;;  %v1839_v33 = vsel %vm937_vm12, %v2457_v25, %v2466_v17 }
 0x1ef   : > { %v2460_v29 = vpop.permute.xlu0 %2459  ;;  %2228 = vmatpush.msk.msra.mxu1 %vm330_vm2, %v1841_v27  ;;  %v1078_v27 = vpop.f32.mrf.mxu0 }
 0x1f0   : > { %v2461_v34 = vunpack.i.l.bf16 %v2460_v29  ;;  %v2462_v52 = vunpack.i.h.bf16 %v2460_v29  ;;  %v1101_v60 = vadd.f32 %v1078_v27, %v999_v63 }
 0x1f1   : > { %1888 = vmatpush.msra.mxu1 %v1839_v33  ;;  %v2475_v55 = vpop.permute.xlu2 %2474 }
 0x1f2   : > { %v1924_v35 = vsel %vm1025_vm13, %v1906_v7, %v2461_v34  ;;  %v2477_v43 = vunpack.i.h.bf16 %v2475_v55  ;;  %v2476_v58 = vunpack.i.l.bf16 %v2475_v55  ;;  %v906_v7 = vpop.f32.mrf.mxu1 }
 0x1f3   : > { %2238 = vmatpush.msk.msra.mxu3 %vm2815_vm6, %v1924_v35  ;;  %v1910_v38 = vpop.permute.xlu1 %1909  ;;  %v910_v13 = vadd.f32 %v906_v7, %v808_v32 }
 0x1f4   : > { %v1925_v42 = vsel %vm1025_vm13, %v1910_v38, %v1912_v16  ;;  %v1835_v10 = vsel %vm937_vm12, %v2476_v58, %v2477_v43 }
 0x1f5   : > { %2232 = vmatpush.msk.msra.mxu2 %vm2809_vm5, %v1925_v42 }
 0x1f7   : > { %v1829_v23 = vpop.permute.xlu0 %1828  ;;  %2233 = vmatpush.msk.msra.mxu2 %vm2809_vm5, %v1923_v0  ;;  %v1312_v38 = vpop.f32.mrf.mxu0 }
 0x1f8   : > { %v1840_v50 = vsel %vm937_vm12, %v1829_v23, %v1831_v45  ;;  %v996_v45 = vpop.f32.mrf.mxu3  ;;  %v1263_v34 = vpop.f32.mrf.mxu2 }
 0x1f9   : > { %2226 = vmatpush.msk.msra.mxu0 %vm330_vm2, %v1840_v50  ;;  %v1000_v46 = vadd.f32 %v996_v45, %v910_v13  ;;  %v1313_v37 = vadd.f32 %v1312_v38, %v1263_v34 }
 0x1fa   : > { %v1098_v2 = vpop.f32.mrf.mxu1 }
 0x1fb   : > { %v1900_v54 = vpop.permute.xlu1 %1899  ;;  %v1102_v33 = vadd.f32 %v1098_v2, %v1000_v46 }
 0x1fc   : > { %v1922_v56 = vsel %vm1025_vm13, %v1900_v54, %v2462_v52 }
 0x1fd   : > { %2239 = vmatpush.msk.msra.mxu3 %vm2815_vm6, %v1922_v56  ;;  %v1105_v28 = vrot.slane %v1102_v33, 4 }
 0x1fe   : > { %2240 = vmatmul.msk.f32.vlgmr.msra.gmra.mxu3 %vm326_vm9, %v2230_v18 }
 0x1ff   : > { %v2470_v62 = vpop.permute.xlu0 %2469  ;;  %v1107_v29 = vsel %vm1106_vm14, %v1101_v60, %v1105_v28 }
 0x200   : > { %v2472_v47 = vunpack.i.h.bf16 %v2470_v62  ;;  %v2471_v57 = vunpack.i.l.bf16 %v2470_v62  ;;  %1109 = vst [vmem:[%s3515_s10] sm:$0x77] %v1107_v29  ;;  %v1283_v31 = vpop.f32.mrf.mxu3 }
 0x202   : > { %v1838_v12 = vsel %vm937_vm12, %v2472_v47, %v2457_v25  ;;  %v1837_v3 = vsel %vm937_vm12, %v2467_v21, %v2471_v57  ;;  %v1332_v6 = vpop.f32.mrf.mxu1 }
 0x203   : > { %1868 = vmatpush.msra.mxu0 %v1838_v12  ;;  %1889 = vmatpush.msra.mxu1 %v1837_v3  ;;  %v1898_v19 = vpop.permute.xlu1 %1897  ;;  %v1333_v39 = vadd.f32 %v1332_v6, %v1283_v31 }
 0x204   : > { %v1921_v8 = vsel %vm1025_vm13, %v1898_v19, %v1900_v54 }
 0x205   : > { %1890 = vmatpush.msra.mxu1 %v1835_v10  ;;  %2234 = vmatpush.msk.msra.mxu2 %vm2809_vm5, %v1921_v8 }
 0x206   : > { %2229 = vmatmul.msk.f32.vlgmr.msra.gmra.mxu1 %vm326_vm9, %v2225_v20  ;;  %2235 = vmatmul.msk.f32.vlgmr.msra.gmra.mxu2 %vm326_vm9, %v2230_v18 }
 0x207   : > { %v2480_v36 = vpop.permute.xlu0 %2479 }
 0x208   : > { %v2482_v16 = vunpack.i.h.bf16 %v2480_v36  ;;  %v2481_v22 = vunpack.i.l.bf16 %v2480_v36 }
 0x20a   : > { %v1836_v17 = vsel %vm937_vm12, %v2481_v22, %v2467_v21  ;;  %v1834_v25 = vsel %vm937_vm12, %v2482_v16, %v2476_v58 }
 0x20b   : > { %1869 = vmatpush.msra.mxu0 %v1836_v17 }
 0x20d   : > { %1870 = vmatpush.msra.mxu0 %v1834_v25 }
 0x20e   : > { %2227 = vmatmul.msk.f32.vlgmr.msra.gmra.mxu0 %vm326_vm9, %v2225_v20  ;;  %v1430_v35 = vpop.f32.mrf.mxu3 }
 0x20f   : > { %v1434_v42 = vadd.f32 %v1430_v35, %v1333_v39 }
 0x216   : > { %v1410_v24 = vpop.f32.mrf.mxu2  ;;  %v1580_v0 = vpop.f32.mrf.mxu3 }
 0x217   : > { %v1433_v44 = vadd.f32 %v1410_v24, %v1313_v37 }
 0x21e   : > { %v1560_v23 = vpop.f32.mrf.mxu2 }
 0x227   : > { %v1510_v49 = vpop.f32.mrf.mxu0 }
 0x228   : > { %v1533_v51 = vadd.f32 %v1510_v49, %v1433_v44 }
 0x22a   : > { %v1583_v55 = vadd.f32 %v1560_v23, %v1533_v51 }
 0x22b   : > { %v1530_v41 = vpop.f32.mrf.mxu1 }
 0x22c   : > { %v1534_v26 = vadd.f32 %v1530_v41, %v1434_v42 }
 0x22e   : > { %v1584_v50 = vadd.f32 %v1580_v0, %v1534_v26 }
 0x245   : > { %v1804_v52 = vpop.f32.mrf.mxu3 }
 0x257   : > { %v1704_v48 = vpop.f32.mrf.mxu1 }
 0x258   : > { %v1708_v54 = vadd.f32 %v1704_v48, %v1584_v50 }
 0x25a   : > { %v1808_v56 = vadd.f32 %v1804_v52, %v1708_v54 }
 0x25d   : > { %v1784_v18 = vpop.f32.mrf.mxu2 }
 0x261   : > { %v1684_v30 = vpop.f32.mrf.mxu0 }
 0x262   : > { %v1707_v43 = vadd.f32 %v1684_v30, %v1583_v55 }
 0x264   : > { %v1807_v61 = vadd.f32 %v1784_v18, %v1707_v43 }
 0x281   : > { %v1992_v59 = vpop.f32.mrf.mxu3 }
 0x283   : > { %v1892_v53 = vpop.f32.mrf.mxu1 }
 0x284   : > { %v1896_v58 = vadd.f32 %v1892_v53, %v1808_v56 }
 0x286   : > { %v1996_v62 = vadd.f32 %v1992_v59, %v1896_v58 }
 0x288   : > { %v1999_v21 = vrot.slane %v1996_v62, 4 }
 0x289   : > { %v1972_v14 = vpop.f32.mrf.mxu2 }
 0x28b   : > { %v1872_v5 = vpop.f32.mrf.mxu0 }
 0x28c   : > { %v1895_v40 = vadd.f32 %v1872_v5, %v1807_v61 }
 0x28e   : > { %v1995_v47 = vadd.f32 %v1972_v14, %v1895_v40 }
 0x290   : > { %v2000_v57 = vsel %vm1106_vm14, %v1995_v47, %v1999_v21 }
 0x291   : > { %2241 = vst [vmem:[%s3515_s10 + $0x8] sm:$0x77] %v2000_v57 }
 0x292 PF: > { %s12_s9 = sadd.s32 1, %s2496_s9  }
 0x293   : > { %p9_p4 = scmp.ge.s32.totalorder %s12_s9, 4  }
 0x295   :  { %11 = sbr.rel (!%p9_p4) target bundleno = 1 (0x1), region = 68 }

</bundles_post_ra>
